<compile_context>
chip_gen: v6e
topology: v6e:2x2x1
jax: 0.10.0
libtpu: 0.0.40
codegen_flags: <defaults>
</compile_context>

<pallas_src>
import jax
import jax.numpy as jnp
import numpy as np
from jax import lax
from jax.experimental import pallas as pl
from jax.experimental.pallas import tpu as pltpu

EMBED_DIM = 32      # embedding_dim (small, consistent with the module)
NUM_HEADS = 4       # num_heads
HEAD_DIM = EMBED_DIM // NUM_HEADS
SEQ_LEN = 8
BATCH = 2


def _make_attention_kernel(num_heads, embed_dim):
    E = embed_dim
    D = E // num_heads

    def kernel(x_ref, w_ref, b_ref, mask_ref, bo_ref, o_ref):
        BL = o_ref.shape[0]
        xf = x_ref[...]                                           # (BL, E)

        # Fused projection: one MXU matmul, lane width 2E + H*E.
        # Columns: [ q (E, pre-scaled by 1/sqrt(D)) | k (E) | vo_0 (E) | ... ].
        proj = jnp.dot(xf, w_ref[...],
                       preferred_element_type=jnp.float32) + b_ref[...]

        mask = mask_ref[...]                                      # (BL, BL) block-diag additive mask
        acc = jnp.zeros((BL, E), jnp.float32)

        # Static unroll over heads: independent MXU/XLU/EUP chains interleave.
        for h in range(num_heads):
            c0 = h * D
            q_h = proj[:, c0:c0 + D]                              # (BL, D), pre-scaled
            k_h = proj[:, E + c0:E + c0 + D]                      # (BL, D)
            vo_h = proj[:, 2 * E + h * E:2 * E + (h + 1) * E]     # (BL, E), Wo folded in

            # Contract last dims of q and k directly -> no k.T (no XLU transpose).
            scores = lax.dot_general(
                q_h, k_h, (((1,), (1,)), ((), ())),
                preferred_element_type=jnp.float32) + mask        # (BL, BL)

            m = jnp.max(scores, axis=-1, keepdims=True)
            p = jnp.exp(scores - m)                               # cross-batch entries -> 0
            denom = jnp.sum(p, axis=-1, keepdims=True)
            attn = p / denom                                      # exact normalization

            acc = acc + jnp.dot(attn, vo_h,
                                preferred_element_type=jnp.float32)

        # Single full-block store.
        o_ref[...] = (acc + bo_ref[...]).astype(o_ref.dtype)

    return kernel


def multihead_self_attention(x, w_fused, b_fused, bo_fused, num_heads):
    """x: (B, L, E).
    w_fused: (E, 2E + H*E)  -> [Wq^T * 1/sqrt(D) | Wk^T | Wv_0^T @ Wo_0 | ...]
    b_fused: (1, 2E + H*E)  -> [bq * 1/sqrt(D) | bk | 0 ...]
    bo_fused: (1, E)        -> out_b + bv @ out_w^T
    """
    B, L, E = x.shape
    BL = B * L
    H = num_heads
    D = E // H

    xf = x.reshape(BL, E)  # lane/sublane-dense slab for the fused projection

    # Block-diagonal additive mask: 0 within a batch, -1e30 across batches.
    seg = jnp.arange(BL, dtype=jnp.int32) // L
    mask = jnp.where(seg[:, None] == seg[None, :], 0.0, -1e30).astype(jnp.float32)

    Wtot = 2 * E + H * E
    flops = 2 * BL * E * Wtot + H * (2 * BL * BL * D + 2 * BL * BL * E)
    transcendentals = H * BL * BL
    bytes_accessed = 4 * (BL * E + E * Wtot + Wtot + BL * BL + E + BL * E)

    out = pl.pallas_call(
        _make_attention_kernel(H, E),
        out_shape=jax.ShapeDtypeStruct((BL, E), x.dtype),
        in_specs=[pl.BlockSpec(memory_space=pltpu.MemorySpace.VMEM)
                  for _ in range(5)],
        out_specs=pl.BlockSpec(memory_space=pltpu.MemorySpace.VMEM),
        cost_estimate=pl.CostEstimate(flops=flops,
                                      transcendentals=transcendentals,
                                      bytes_accessed=bytes_accessed),
    )(xf, w_fused, b_fused, mask, bo_fused)
    return out.reshape(B, L, E)


def pack_params(in_proj_w, in_proj_b, out_w, out_b, num_heads):
    """Pack torch-style nn.MultiheadAttention params for the kernel.
    in_proj_w: (3E, E), in_proj_b: (3E,), out_w: (E, E), out_b: (E,)."""
    E = out_w.shape[0]
    D = E // num_heads
    scale = 1.0 / (D ** 0.5)

    wq = in_proj_w[:E].T * scale          # (E, E), scale folded in
    wk = in_proj_w[E:2 * E].T             # (E, E)
    wo_t = out_w.T                        # (E, E): ctx @ out_w.T

    wvo = []
    for h in range(num_heads):
        wv_h = in_proj_w[2 * E + h * D: 2 * E + (h + 1) * D]      # (D, E)
        wvo.append(wv_h.T @ wo_t[h * D:(h + 1) * D, :])           # (E, E)

    w_fused = jnp.concatenate([wq, wk] + wvo, axis=1)             # (E, 2E + H*E)
    b_fused = jnp.concatenate(
        [in_proj_b[:E] * scale, in_proj_b[E:2 * E],
         jnp.zeros((num_heads * E,), in_proj_b.dtype)]).reshape(1, -1)
    # V bias passes through row-stochastic attention unchanged, then through Wo:
    bo_fused = (out_b + in_proj_b[2 * E:] @ wo_t).reshape(1, E)
    return w_fused, b_fused, bo_fused


def reference_mha(x, in_proj_w, in_proj_b, out_w, out_b):
    """Pure-JAX replica of torch.nn.MultiheadAttention forward (batch_first, self-attn)."""
    B, L, E = x.shape
    q = x @ in_proj_w[:E].T + in_proj_b[:E]
    k = x @ in_proj_w[E:2 * E].T + in_proj_b[E:2 * E]
    v = x @ in_proj_w[2 * E:].T + in_proj_b[2 * E:]

    def split(t):
        return t.reshape(B, L, NUM_HEADS, HEAD_DIM).transpose(0, 2, 1, 3)

    qh, kh, vh = split(q), split(k), split(v)
    scores = jnp.einsum('bhqd,bhkd->bhqk', qh, kh) / jnp.sqrt(HEAD_DIM).astype(x.dtype)
    attn = jax.nn.softmax(scores, axis=-1)
    ctx = jnp.einsum('bhqk,bhkd->bhqd', attn, vh).transpose(0, 2, 1, 3).reshape(B, L, E)
    return ctx @ out_w.T + out_b


if __name__ == "__main__":
    # Pin matmul precision so the in-kernel dots and the XLA reference agree.
    jax.config.update("jax_default_matmul_precision", "highest")

    key = jax.random.PRNGKey(0)
    kx, kw_in, kb_in, kw_out, kb_out = jax.random.split(key, 5)

    E = EMBED_DIM
    x = jax.random.normal(kx, (BATCH, SEQ_LEN, E), dtype=jnp.float32)

    # nn.MultiheadAttention parameter shapes:
    #   in_proj_weight: (3E, E), in_proj_bias: (3E,), out_proj: Linear(E, E) + bias.
    in_proj_w = 0.05 * jax.random.normal(kw_in, (3 * E, E), dtype=jnp.float32)
    in_proj_b = 0.05 * jax.random.normal(kb_in, (3 * E,), dtype=jnp.float32)
    out_w = 0.05 * jax.random.normal(kw_out, (E, E), dtype=jnp.float32)
    out_b = 0.05 * jax.random.normal(kb_out, (E,), dtype=jnp.float32)

    w_fused, b_fused, bo_fused = pack_params(in_proj_w, in_proj_b, out_w, out_b, NUM_HEADS)

    out = multihead_self_attention(x, w_fused, b_fused, bo_fused, NUM_HEADS)
    out = jax.block_until_ready(out)

    ref = reference_mha(x, in_proj_w, in_proj_b, out_w, out_b)
    np.testing.assert_allclose(np.asarray(out), np.asarray(ref), rtol=1e-3, atol=2e-4)

    print("KERNEL_OK")
</pallas_src>

<mosaic_0001>
module attributes {stable_mosaic.version = 11 : i64} {
  func.func @kernel(%arg0: memref<16x32xf32, #tpu.memory_space<vmem>>, %arg1: memref<32x192xf32, #tpu.memory_space<vmem>>, %arg2: memref<1x192xf32, #tpu.memory_space<vmem>>, %arg3: memref<16x16xf32, #tpu.memory_space<vmem>>, %arg4: memref<1x32xf32, #tpu.memory_space<vmem>>, %arg5: memref<16x32xf32, #tpu.memory_space<vmem>>) attributes {dimension_semantics = [], scalar_prefetch = 0 : i64, scratch_operands = 0 : i64, tpu.core_type = #tpu.core_type<tc>} {
    %c0 = arith.constant 0 : index
    %c0_0 = arith.constant 0 : index
    %0 = vector.load %arg0[%c0, %c0_0] : memref<16x32xf32, #tpu.memory_space<vmem>>, vector<16x32xf32>
    %c0_1 = arith.constant 0 : index
    %c0_2 = arith.constant 0 : index
    %1 = vector.load %arg1[%c0_1, %c0_2] : memref<32x192xf32, #tpu.memory_space<vmem>>, vector<32x192xf32>
    %cst = arith.constant dense<0.000000e+00> : vector<16x192xf32>
    %2 = tpu.matmul %0, %1, %cst {dimension_numbers = #tpu.dot_dimension_numbers<[1], [0], [0], [1], [0, 0, 1, 1], [], []>, precision = #tpu.contract_precision<fp32>} : vector<16x32xf32>, vector<32x192xf32>, vector<16x192xf32> -> vector<16x192xf32>
    %c0_3 = arith.constant 0 : index
    %c0_4 = arith.constant 0 : index
    %3 = vector.load %arg2[%c0_3, %c0_4] : memref<1x192xf32, #tpu.memory_space<vmem>>, vector<1x192xf32>
    %4 = vector.broadcast %3 : vector<1x192xf32> to vector<16x192xf32>
    %5 = arith.addf %2, %4 : vector<16x192xf32>
    %c0_5 = arith.constant 0 : index
    %c0_6 = arith.constant 0 : index
    %6 = vector.load %arg3[%c0_5, %c0_6] : memref<16x16xf32, #tpu.memory_space<vmem>>, vector<16x16xf32>
    %cst_7 = arith.constant 0.000000e+00 : f32
    %7 = vector.broadcast %cst_7 : f32 to vector<16x32xf32>
    %8 = vector.extract_strided_slice %5 {offsets = [0, 0], sizes = [16, 8], strides = [1, 1]} : vector<16x192xf32> to vector<16x8xf32>
    %9 = vector.extract_strided_slice %5 {offsets = [0, 32], sizes = [16, 8], strides = [1, 1]} : vector<16x192xf32> to vector<16x8xf32>
    %10 = vector.extract_strided_slice %5 {offsets = [0, 64], sizes = [16, 32], strides = [1, 1]} : vector<16x192xf32> to vector<16x32xf32>
    %cst_8 = arith.constant dense<0.000000e+00> : vector<16x16xf32>
    %11 = tpu.matmul %8, %9, %cst_8 {dimension_numbers = #tpu.dot_dimension_numbers<[1], [1], [0], [0], [0, 0, 1, 0], [], []>, precision = #tpu.contract_precision<fp32>} : vector<16x8xf32>, vector<16x8xf32>, vector<16x16xf32> -> vector<16x16xf32>
    %12 = arith.addf %11, %6 : vector<16x16xf32>
    %cst_9 = arith.constant dense<0xFF800000> : vector<16xf32>
    %13 = vector.multi_reduction <maximumf>, %12, %cst_9 [1] : vector<16x16xf32> to vector<16xf32>
    %14 = vector.shape_cast %13 : vector<16xf32> to vector<16x1xf32>
    %15 = vector.broadcast %14 : vector<16x1xf32> to vector<16x16xf32>
    %16 = arith.subf %12, %15 : vector<16x16xf32>
    %17 = math.exp %16 : vector<16x16xf32>
    %cst_10 = arith.constant dense<0.000000e+00> : vector<16xf32>
    %18 = vector.multi_reduction <add>, %17, %cst_10 [1] : vector<16x16xf32> to vector<16xf32>
    %19 = vector.shape_cast %18 : vector<16xf32> to vector<16x1xf32>
    %20 = vector.broadcast %19 : vector<16x1xf32> to vector<16x16xf32>
    %21 = arith.divf %17, %20 : vector<16x16xf32>
    %cst_11 = arith.constant dense<0.000000e+00> : vector<16x32xf32>
    %22 = tpu.matmul %21, %10, %cst_11 {dimension_numbers = #tpu.dot_dimension_numbers<[1], [0], [0], [1], [0, 0, 1, 1], [], []>, precision = #tpu.contract_precision<fp32>} : vector<16x16xf32>, vector<16x32xf32>, vector<16x32xf32> -> vector<16x32xf32>
    %23 = arith.addf %7, %22 : vector<16x32xf32>
    %24 = vector.extract_strided_slice %5 {offsets = [0, 8], sizes = [16, 8], strides = [1, 1]} : vector<16x192xf32> to vector<16x8xf32>
    %25 = vector.extract_strided_slice %5 {offsets = [0, 40], sizes = [16, 8], strides = [1, 1]} : vector<16x192xf32> to vector<16x8xf32>
    %26 = vector.extract_strided_slice %5 {offsets = [0, 96], sizes = [16, 32], strides = [1, 1]} : vector<16x192xf32> to vector<16x32xf32>
    %cst_12 = arith.constant dense<0.000000e+00> : vector<16x16xf32>
    %27 = tpu.matmul %24, %25, %cst_12 {dimension_numbers = #tpu.dot_dimension_numbers<[1], [1], [0], [0], [0, 0, 1, 0], [], []>, precision = #tpu.contract_precision<fp32>} : vector<16x8xf32>, vector<16x8xf32>, vector<16x16xf32> -> vector<16x16xf32>
    %28 = arith.addf %27, %6 : vector<16x16xf32>
    %cst_13 = arith.constant dense<0xFF800000> : vector<16xf32>
    %29 = vector.multi_reduction <maximumf>, %28, %cst_13 [1] : vector<16x16xf32> to vector<16xf32>
    %30 = vector.shape_cast %29 : vector<16xf32> to vector<16x1xf32>
    %31 = vector.broadcast %30 : vector<16x1xf32> to vector<16x16xf32>
    %32 = arith.subf %28, %31 : vector<16x16xf32>
    %33 = math.exp %32 : vector<16x16xf32>
    %cst_14 = arith.constant dense<0.000000e+00> : vector<16xf32>
    %34 = vector.multi_reduction <add>, %33, %cst_14 [1] : vector<16x16xf32> to vector<16xf32>
    %35 = vector.shape_cast %34 : vector<16xf32> to vector<16x1xf32>
    %36 = vector.broadcast %35 : vector<16x1xf32> to vector<16x16xf32>
    %37 = arith.divf %33, %36 : vector<16x16xf32>
    %cst_15 = arith.constant dense<0.000000e+00> : vector<16x32xf32>
    %38 = tpu.matmul %37, %26, %cst_15 {dimension_numbers = #tpu.dot_dimension_numbers<[1], [0], [0], [1], [0, 0, 1, 1], [], []>, precision = #tpu.contract_precision<fp32>} : vector<16x16xf32>, vector<16x32xf32>, vector<16x32xf32> -> vector<16x32xf32>
    %39 = arith.addf %23, %38 : vector<16x32xf32>
    %40 = vector.extract_strided_slice %5 {offsets = [0, 16], sizes = [16, 8], strides = [1, 1]} : vector<16x192xf32> to vector<16x8xf32>
    %41 = vector.extract_strided_slice %5 {offsets = [0, 48], sizes = [16, 8], strides = [1, 1]} : vector<16x192xf32> to vector<16x8xf32>
    %42 = vector.extract_strided_slice %5 {offsets = [0, 128], sizes = [16, 32], strides = [1, 1]} : vector<16x192xf32> to vector<16x32xf32>
    %cst_16 = arith.constant dense<0.000000e+00> : vector<16x16xf32>
    %43 = tpu.matmul %40, %41, %cst_16 {dimension_numbers = #tpu.dot_dimension_numbers<[1], [1], [0], [0], [0, 0, 1, 0], [], []>, precision = #tpu.contract_precision<fp32>} : vector<16x8xf32>, vector<16x8xf32>, vector<16x16xf32> -> vector<16x16xf32>
    %44 = arith.addf %43, %6 : vector<16x16xf32>
    %cst_17 = arith.constant dense<0xFF800000> : vector<16xf32>
    %45 = vector.multi_reduction <maximumf>, %44, %cst_17 [1] : vector<16x16xf32> to vector<16xf32>
    %46 = vector.shape_cast %45 : vector<16xf32> to vector<16x1xf32>
    %47 = vector.broadcast %46 : vector<16x1xf32> to vector<16x16xf32>
    %48 = arith.subf %44, %47 : vector<16x16xf32>
    %49 = math.exp %48 : vector<16x16xf32>
    %cst_18 = arith.constant dense<0.000000e+00> : vector<16xf32>
    %50 = vector.multi_reduction <add>, %49, %cst_18 [1] : vector<16x16xf32> to vector<16xf32>
    %51 = vector.shape_cast %50 : vector<16xf32> to vector<16x1xf32>
    %52 = vector.broadcast %51 : vector<16x1xf32> to vector<16x16xf32>
    %53 = arith.divf %49, %52 : vector<16x16xf32>
    %cst_19 = arith.constant dense<0.000000e+00> : vector<16x32xf32>
    %54 = tpu.matmul %53, %42, %cst_19 {dimension_numbers = #tpu.dot_dimension_numbers<[1], [0], [0], [1], [0, 0, 1, 1], [], []>, precision = #tpu.contract_precision<fp32>} : vector<16x16xf32>, vector<16x32xf32>, vector<16x32xf32> -> vector<16x32xf32>
    %55 = arith.addf %39, %54 : vector<16x32xf32>
    %56 = vector.extract_strided_slice %5 {offsets = [0, 24], sizes = [16, 8], strides = [1, 1]} : vector<16x192xf32> to vector<16x8xf32>
    %57 = vector.extract_strided_slice %5 {offsets = [0, 56], sizes = [16, 8], strides = [1, 1]} : vector<16x192xf32> to vector<16x8xf32>
    %58 = vector.extract_strided_slice %5 {offsets = [0, 160], sizes = [16, 32], strides = [1, 1]} : vector<16x192xf32> to vector<16x32xf32>
    %cst_20 = arith.constant dense<0.000000e+00> : vector<16x16xf32>
    %59 = tpu.matmul %56, %57, %cst_20 {dimension_numbers = #tpu.dot_dimension_numbers<[1], [1], [0], [0], [0, 0, 1, 0], [], []>, precision = #tpu.contract_precision<fp32>} : vector<16x8xf32>, vector<16x8xf32>, vector<16x16xf32> -> vector<16x16xf32>
    %60 = arith.addf %59, %6 : vector<16x16xf32>
    %cst_21 = arith.constant dense<0xFF800000> : vector<16xf32>
    %61 = vector.multi_reduction <maximumf>, %60, %cst_21 [1] : vector<16x16xf32> to vector<16xf32>
    %62 = vector.shape_cast %61 : vector<16xf32> to vector<16x1xf32>
    %63 = vector.broadcast %62 : vector<16x1xf32> to vector<16x16xf32>
    %64 = arith.subf %60, %63 : vector<16x16xf32>
    %65 = math.exp %64 : vector<16x16xf32>
    %cst_22 = arith.constant dense<0.000000e+00> : vector<16xf32>
    %66 = vector.multi_reduction <add>, %65, %cst_22 [1] : vector<16x16xf32> to vector<16xf32>
    %67 = vector.shape_cast %66 : vector<16xf32> to vector<16x1xf32>
    %68 = vector.broadcast %67 : vector<16x1xf32> to vector<16x16xf32>
    %69 = arith.divf %65, %68 : vector<16x16xf32>
    %cst_23 = arith.constant dense<0.000000e+00> : vector<16x32xf32>
    %70 = tpu.matmul %69, %58, %cst_23 {dimension_numbers = #tpu.dot_dimension_numbers<[1], [0], [0], [1], [0, 0, 1, 1], [], []>, precision = #tpu.contract_precision<fp32>} : vector<16x16xf32>, vector<16x32xf32>, vector<16x32xf32> -> vector<16x32xf32>
    %71 = arith.addf %55, %70 : vector<16x32xf32>
    %c0_24 = arith.constant 0 : index
    %c0_25 = arith.constant 0 : index
    %72 = vector.load %arg4[%c0_24, %c0_25] : memref<1x32xf32, #tpu.memory_space<vmem>>, vector<1x32xf32>
    %73 = vector.broadcast %72 : vector<1x32xf32> to vector<16x32xf32>
    %74 = arith.addf %71, %73 : vector<16x32xf32>
    %c0_26 = arith.constant 0 : index
    %c0_27 = arith.constant 0 : index
    %75 = vector.load %arg5[%c0_26, %c0_27] : memref<16x32xf32, #tpu.memory_space<vmem>>, vector<16x32xf32>
    tpu.vector_store %arg5[%c0_26, %c0_27], %74 {strides = array<i32>} : memref<16x32xf32, #tpu.memory_space<vmem>>, vector<16x32xf32>,
    return
  }
}

</mosaic_0001>

<bundles_post_ra>
// kernel: tpu_custom_call.1
= control target key start
LH: loop header
LB: loop body
LE: loop exit
PB: predicated region body
PF: predicated region fallthrough
CT: control target
= control target key end

     0   :  { %10 = vsyncpa [#allocation3], 0  ;;  %s6251_s0 = inlined_call_operand.hbm [shape: f32[16,32], index: 0, kind: input, shape index: {}]   ;;  %s6252_s1 = inlined_call_operand.hbm [shape: f32[32,192], index: 1, kind: input, shape index: {}]   ;;  %s6253_s2 = inlined_call_operand.vmem [shape: f32[1,192], index: 2, kind: input, shape index: {}]   ;;  %s6254_s3 = inlined_call_operand.hbm [shape: f32[16,16], index: 3, kind: input, shape index: {}]   ;;  %s6255_s4 = inlined_call_operand.vmem [shape: f32[1,32], index: 4, kind: input, shape index: {}]   ;;  %s6256_s5 = inlined_call_operand.hbm [shape: f32[16,32], index: 5, kind: output, shape index: {}]  }
   0x1   :  { %11 = vsyncpa [#allocation6], 0 }
   0x2   :  { %12 = vsyncpa [#allocation4], 0  ;;  %s5597_s18 = smov [#allocation5]  }
   0x3   :  { %s30_s19 = sshll.u32 %s5597_s18, 4  ;;  %s31_s19 = int_to_ptr.vmem [resolvable:$true] %s30_s19 }
   0x4   :  { %s5519_s20 = scalar_lea.vmem %s31_s19, 1024  ;;  %p5524_p1 = scmp.lt.s32.totalorder %s31_s19, %s31_s19 }
   0x5   :  { %p5520_p0 = scmp.ne.s32.totalorder %s31_s19, %s5519_s20  ;;  %p5525_p2 = scmp.lt.s32.totalorder %s5519_s20, %s5519_s20 }
   0x7   :  { %p5526_p3 = por %p5525_p2, %p5524_p1 }
   0x9   :  { %p5527_p4 = pnand %p5526_p3, %p5520_p0 }
   0xb   :  { %5530 = shalt.err (!%p5527_p4)
}
   0xc   :  { %s5598_s21 = smov 256   ;;  %s5599_s22 = smov 16  }
   0xd   :  { %36 = dma.hbm_to_vmem [thread:$0]  %s6252_s1, 1024, %s31_s19, [#allocation6], %s5598_s21, %s5598_s21, %s5599_s22  }
   0xe   :  { %s5600_s25 = smov [#allocation2]  }
   0xf   :  { %s18_s26 = sshll.u32 %s5600_s25, 4  ;;  %s19_s26 = int_to_ptr.vmem [resolvable:$true] %s18_s26 }
  0x10   :  { %s5539_s27 = scalar_lea.vmem %s19_s26, 256  ;;  %p5544_p6 = scmp.lt.s32.totalorder %s19_s26, %s19_s26 }
  0x11   :  { %p5540_p5 = scmp.ne.s32.totalorder %s19_s26, %s5539_s27  ;;  %p5545_p7 = scmp.lt.s32.totalorder %s5539_s27, %s5539_s27 }
  0x13   :  { %p5546_p8 = por %p5545_p7, %p5544_p6 }
  0x15   :  { %p5547_p9 = pnand %p5546_p8, %p5540_p5 }
  0x17   :  { %5550 = shalt.err (!%p5547_p9)
}
  0x18   :  { %s5601_s28 = smov 128   ;;  %s5602_s29 = smov 8  }
  0x19   :  { %24 = dma.hbm_to_vmem [thread:$0]  %s6251_s0, 256, %s19_s26, [#allocation3], %s5601_s28, %s5601_s28, %s5602_s29  }
  0x1a   :  { %s5603_s1 = smov [#allocation7]  }
  0x1b   :  { %s44_s7 = sshll.u32 %s5603_s1, 4  ;;  %s45_s7 = int_to_ptr.vmem [resolvable:$true] %s44_s7 }
  0x1c   :  { %s5559_s8 = scalar_lea.vmem %s45_s7, 256  ;;  %p5564_p11 = scmp.lt.s32.totalorder %s45_s7, %s45_s7 }
  0x1d   :  { %p5560_p10 = scmp.ne.s32.totalorder %s45_s7, %s5559_s8  ;;  %p5565_p12 = scmp.lt.s32.totalorder %s5559_s8, %s5559_s8 }
  0x1f   :  { %p5566_p13 = por %p5565_p12, %p5564_p11 }
  0x21   :  { %p5567_p0 = pnand %p5566_p13, %p5560_p10 }
  0x23   :  { %5570 = shalt.err (!%p5567_p0)
}
  0x24   :  { %50 = dma.hbm_to_vmem [thread:$0]  %s6254_s3, 256, %s45_s7, [#allocation6], %s5601_s28, %s5601_s28, %s5602_s29  }
  0x25   :  { %5591 = dma.done.wait [#allocation3], 256  }
  0x26   :  { %5592 = vsyncadd [#allocation3], 4294967040 }
  0x27   :  { %5593 = dma.done.wait [#allocation6], 1280  }
  0x28   :  { %5594 = vsyncadd [#allocation6], 4294966016  ;;  %v5604_v0 = vmov 0.0   ;;  %v71_v1 = vld [vmem:[#allocation5 + $0x38] sm:$0xff]  ;;  %v70_v2 = vld [vmem:[#allocation5 + $0x30] sm:$0xff]  ;;  %vm84_vm0 = vcmask 261120   ;;  %v74_v63 = vlaneseq }
  0x29   :  { %163 = vmatprep.mubr.f32.mxu0 %v5604_v0  ;;  %290 = vmatprep.mubr.f32.mxu1 %v5604_v0  ;;  %v69_v3 = vld [vmem:[#allocation5 + $0x28] sm:$0xff]  ;;  %v5662_v4 = vand.u32 4294901760, %v71_v1  ;;  %v5664_v5 = vand.u32 4294901760, %v70_v2  ;;  %v68_v7 = vld [vmem:[#allocation5 + $0x20] sm:$0xff]  ;;  %v67_v8 = vld [vmem:[#allocation5 + $0x18] sm:$0xff]  ;;  %vm691_vm1 = vcmask 64512  }
  0x2a   :  { %v5666_v6 = vand.u32 4294901760, %v69_v3  ;;  %v66_v9 = vld [vmem:[#allocation5 + $0x10] sm:$0xff]  ;;  %v5668_v10 = vand.u32 4294901760, %v68_v7  ;;  %v5670_v11 = vand.u32 4294901760, %v67_v8  ;;  %v65_v13 = vld [vmem:[#allocation5 + $0x8] sm:$0xff]  ;;  %v64_v14 = vld [vmem:[#allocation5] sm:$0xff] }
  0x2b   :  { %v5672_v12 = vand.u32 4294901760, %v66_v9  ;;  %v62_v15 = vld [vmem:[#allocation2] sm:$0xff]  ;;  %116 = vmatprep.subr.mxu0 %v5662_v4  ;;  %v5675_v16 = vand.u32 4294901760, %v65_v13  ;;  %v5678_v17 = vsub.f32 %v71_v1, %v5662_v4  ;;  %v5680_v18 = vand.u32 4294901760, %v64_v14  ;;  %v63_v20 = vld [vmem:[#allocation2 + $0x8] sm:$0xff]  ;;  %s5606_s11 = smov 96  }
  0x2c   :  { %v5683_v19 = vsub.f32 %v70_v2, %v5664_v5  ;;  %118 = vmatpush1.msra.mxu0 %v5664_v5  ;;  %v86_v21 = vsel %vm84_vm0, %v62_v15, 0  ;;  %v5688_v22 = vsub.f32 %v69_v3, %v5666_v6  ;;  %v5691_v23 = vsub.f32 %v68_v7, %v5668_v10  ;;  %v72_v3 = vld [vmem:[%s6253_s2] sm:$0x3]  ;;  %s5605_s2 = smov 88   ;;  %s5607_s12 = smov 120  }
  0x2d   :  { %v5694_v24 = vsub.f32 %v67_v8, %v5670_v11  ;;  %120 = vmatprep.subr.mxu0 %v5666_v6  ;;  %v212_v25 = vand.u32 4294901760, %v5678_v17  ;;  %v5699_v27 = vand.u32 4294901760, %v86_v21  ;;  %v5702_v28 = vsub.f32 %v66_v9, %v5672_v12  ;;  %s5608_s13 = smov 32   ;;  %s5609_s14 = smov 64  }
  0x2e   :  { %v218_v26 = vand.u32 4294901760, %v5683_v19  ;;  %122 = vmatpush1.msra.mxu0 %v5668_v10  ;;  %v224_v29 = vand.u32 4294901760, %v5688_v22  ;;  %v230_v30 = vand.u32 4294901760, %v5691_v23  ;;  %v89_v32 = vsel %vm84_vm0, %v63_v20, 0  ;;  %s5610_s15 = smov 80   ;;  %s5611_s16 = smov 112  }
  0x2f   :  { %v236_v31 = vand.u32 4294901760, %v5694_v24  ;;  %124 = vmatprep.subr.mxu0 %v5670_v11  ;;  %v213_v33 = vsub.f32 %v5678_v17, %v212_v25  ;;  %v5717_v35 = vsub.f32 %v86_v21, %v5699_v27  ;;  %v242_v36 = vand.u32 4294901760, %v5702_v28  ;;  %s5612_s17 = smov 72   ;;  %s5613_s18 = smov 104  }
  0x30   :  { %v219_v34 = vsub.f32 %v5683_v19, %v218_v26  ;;  %126 = vmatpush1.msra.mxu0 %v5672_v12  ;;  %v225_v37 = vsub.f32 %v5688_v22, %v224_v29  ;;  %v231_v38 = vsub.f32 %v5691_v23, %v230_v30  ;;  %v5730_v40 = vand.u32 4294901760, %v89_v32  ;;  %s5614_s21 = smov [#allocation8]  }
  0x31   :  { %v237_v39 = vsub.f32 %v5694_v24, %v236_v31  ;;  %128 = vmatprep.subr.mxu0 %v5675_v16  ;;  %v214_v41 = vand.u32 4294901760, %v213_v33  ;;  %v166_v43 = vand.u32 4294901760, %v5717_v35  ;;  %v243_v44 = vsub.f32 %v5702_v28, %v242_v36  ;;  %s4917_s22 = sshll.u32 %s5614_s21, 4  ;;  %s4918_s22 = int_to_ptr.vmem [resolvable:$true] %s4917_s22 }
  0x32   :  { %v220_v42 = vand.u32 4294901760, %v219_v34  ;;  %130 = vmatpush1.msra.mxu0 %v5680_v18  ;;  %v226_v45 = vand.u32 4294901760, %v225_v37  ;;  %v232_v46 = vand.u32 4294901760, %v231_v38  ;;  %v5739_v47 = vsub.f32 %v89_v32, %v5730_v40  ;;  %s5571_s23 = scalar_lea.vmem %s4918_s22, 256  ;;  %p5576_p2 = scmp.lt.s32.totalorder %s4918_s22, %s4918_s22 }
  0x33   :  { %215 = vmatprep.subr.mxu1 %v214_v41  ;;  %v167_v48 = vsub.f32 %v5717_v35, %v166_v43  ;;  %331 = vmatprep.subr.mxu0 %v5678_v17  ;;  %v238_v49 = vand.u32 4294901760, %v237_v39  ;;  %v247_v50 = vsub.f32 %v65_v13, %v5675_v16  ;;  %v253_v51 = vsub.f32 %v64_v14, %v5680_v18  ;;  %p5572_p1 = scmp.ne.s32.totalorder %s4918_s22, %s5571_s23  ;;  %p5577_p3 = scmp.lt.s32.totalorder %s5571_s23, %s5571_s23 }
  0x34   :  { %221 = vmatpush1.msra.mxu1 %v220_v42  ;;  %v177_v52 = vand.u32 4294901760, %v5739_v47  ;;  %v244_v54 = vand.u32 4294901760, %v243_v44  ;;  %v75_v1 = vshrl.u32 %v74_v63, 7  ;;  %vm1202_vm2 = vcmask 130048  }
  0x35   :  { %v168_v53 = vand.u32 4294901760, %v167_v48  ;;  %227 = vmatprep.subr.mxu1 %v226_v45  ;;  %v248_v55 = vand.u32 4294901760, %v247_v50  ;;  %v254_v56 = vand.u32 4294901760, %v253_v51  ;;  %p5578_p4 = por %p5577_p3, %p5576_p2 }
  0x36   :  { %233 = vmatpush1.msra.mxu1 %v232_v46  ;;  %v178_v57 = vsub.f32 %v5739_v47, %v177_v52  ;;  %v80_v2 = vsub.s32 1, %v75_v1  ;;  %v76_v8 = vsub.s32 0, %v75_v1 }
  0x37   :  { %169 = vmatmul.mubr.f32.vlgmr.msra.gmra.mxu0 %v168_v53  ;;  %239 = vmatprep.subr.mxu1 %v238_v49  ;;  %v249_v58 = vsub.f32 %v247_v50, %v248_v55  ;;  %v255_v59 = vsub.f32 %v253_v51, %v254_v56  ;;  %p5579_p5 = pnand %p5578_p4, %p5572_p1 }
  0x38   :  { %334 = vmatpush1.msra.mxu0 %v5683_v19  ;;  %174 = vmatprep.mubr.f32.mxu0 %v5604_v0  ;;  %v179_v60 = vand.u32 4294901760, %v178_v57  ;;  %v77_v13 = vrot.slane %v72_v3, %v76_v8 }
  0x39   :  { %337 = vmatprep.subr.mxu0 %v5688_v22  ;;  %245 = vmatpush1.msra.mxu1 %v244_v54  ;;  %v250_v61 = vand.u32 4294901760, %v249_v58  ;;  %v256_v62 = vand.u32 4294901760, %v255_v59 }
  0x3a   :  { %340 = vmatpush1.msra.mxu0 %v5691_v23 }
  0x3b   :  { %180 = vmatmul.mubr.f32.gmra.mxu0 %v179_v60  ;;  %251 = vmatprep.subr.mxu1 %v250_v61 }
  0x3c   :  { %343 = vmatprep.subr.mxu0 %v5694_v24  ;;  %257 = vmatpush1.msra.mxu1 %v256_v62 }
  0x3d   :  { %346 = vmatpush1.msra.mxu0 %v5702_v28  ;;  %292 = vmatmul.mubr.f32.vlgmr.msra.gmra.mxu1 %v5699_v27 }
  0x3e   :  { %349 = vmatprep.subr.mxu0 %v247_v50  ;;  %427 = vmatprep.subr.mxu1 %v5662_v4 }
  0x3f   :  { %352 = vmatpush1.msra.mxu0 %v253_v51  ;;  %385 = vmatprep.mubr.f32.mxu0 %v5604_v0 }
  0x40   :  { %429 = vmatpush1.msra.mxu1 %v5664_v5  ;;  %388 = vmatmul.mubr.f32.vlgmr.msra.gmra.mxu0 %v5717_v35 }
  0x41   :  { %431 = vmatprep.subr.mxu1 %v5666_v6  ;;  %520 = vmatprep.subr.mxu0 %v212_v25 }
  0x42   :  { %297 = vmatprep.mubr.f32.mxu1 %v5604_v0  ;;  %433 = vmatpush1.msra.mxu1 %v5668_v10 }
  0x43   :  { %524 = vmatpush1.msra.mxu0 %v218_v26  ;;  %299 = vmatmul.mubr.f32.gmra.mxu1 %v5730_v40 }
  0x44   :  { %435 = vmatprep.subr.mxu1 %v5670_v11  ;;  %528 = vmatprep.subr.mxu0 %v224_v29 }
  0x45   :  { %393 = vmatprep.mubr.f32.mxu0 %v5604_v0  ;;  %437 = vmatpush1.msra.mxu1 %v5672_v12 }
  0x46   :  { %532 = vmatpush1.msra.mxu0 %v230_v30  ;;  %439 = vmatprep.subr.mxu1 %v5675_v16 }
  0x47   :  { %396 = vmatmul.mubr.f32.gmra.mxu0 %v5739_v47  ;;  %536 = vmatprep.subr.mxu0 %v236_v31 }
  0x48   :  { %441 = vmatpush1.msra.mxu1 %v5680_v18  ;;  %474 = vmatprep.mubr.f32.mxu1 %v5604_v0 }
  0x49   :  { %540 = vmatpush1.msra.mxu0 %v242_v36  ;;  %478 = vmatmul.mubr.f32.vlgmr.msra.gmra.mxu1 %v166_v43 }
  0x4a   :  { %544 = vmatprep.subr.mxu0 %v248_v55  ;;  %621 = vmatprep.subr.mxu1 %v5662_v4 }
  0x4b   :  { %548 = vmatpush1.msra.mxu0 %v254_v56  ;;  %581 = vmatprep.mubr.f32.mxu0 %v5604_v0 }
  0x4c   :  { %623 = vmatpush1.msra.mxu1 %v5664_v5  ;;  %583 = vmatmul.mubr.f32.vlgmr.msra.gmra.mxu0 %v5699_v27 }
  0x4d   :  { %625 = vmatprep.subr.mxu1 %v5666_v6  ;;  %483 = vmatprep.mubr.f32.mxu1 %v5604_v0  ;;  %v81_v6 = vrot.slane %v72_v3, %v80_v2 }
  0x4e   :  { %627 = vmatpush1.msra.mxu1 %v5668_v10  ;;  %588 = vmatprep.mubr.f32.mxu0 %v5604_v0 }
  0x4f   :  { %487 = vmatmul.mubr.f32.gmra.mxu1 %v177_v52  ;;  %629 = vmatprep.subr.mxu1 %v5670_v11 }
  0x50   :  { %631 = vmatpush1.msra.mxu1 %v5672_v12  ;;  %590 = vmatmul.mubr.f32.gmra.mxu0 %v5730_v40 }
  0x51   :  { %633 = vmatprep.subr.mxu1 %v5675_v16  ;;  %668 = vmatprep.mubr.f32.mxu1 %v5604_v0 }
  0x52   :  { %635 = vmatpush1.msra.mxu1 %v5680_v18 }
  0x53   :  { %670 = vmatmul.mubr.f32.vlgmr.msra.gmra.mxu1 %v5699_v27 }
  0x54   :  { %675 = vmatprep.mubr.f32.mxu1 %v5604_v0 }
  0x57   :  { %677 = vmatmul.mubr.f32.gmra.mxu1 %v5730_v40 }
  0xf7   :  { %v170_v4 = vpop.f32.mrf.mxu0 }
  0xf8   :  { %v171_v18 = vadd.f32 %v170_v4, %v77_v13 }
  0xf9   :  { %v172_v5 = vpop.f32.mrf.mxu0 }
  0xfa   :  { %v173_v11 = vadd.f32 %v172_v5, %v81_v6 }
  0xfb   :  { %v181_v7 = vpop.f32.mrf.mxu0 }
  0xfc   :  { %v182_v23 = vadd.f32 %v181_v7, %v77_v13 }
  0xfd   :  { %v183_v9 = vpop.f32.mrf.mxu0  ;;  %v293_v10 = vpop.f32.mrf.mxu1 }
  0xfe   :  { %v184_v19 = vadd.f32 %v183_v9, %v81_v6  ;;  %v294_v24 = vadd.f32 %v293_v10, %v171_v18 }
  0xff   :  { %v295_v12 = vpop.f32.mrf.mxu1 }
 0x100   :  { %v296_v0 = vadd.f32 %v295_v12, %v173_v11  ;;  %v389_v14 = vpop.f32.mrf.mxu0 }
 0x101   :  { %v390_v29 = vadd.f32 %v389_v14, %v294_v24 }
 0x102   :  { %v391_v15 = vpop.f32.mrf.mxu0 }
 0x103   :  { %v300_v16 = vpop.f32.mrf.mxu1  ;;  %v392_v17 = vadd.f32 %v391_v15, %v296_v0 }
 0x104   :  { %v301_v30 = vadd.f32 %v300_v16, %v182_v23 }
 0x105   :  { %v302_v20 = vpop.f32.mrf.mxu1 }
 0x106   :  { %v303_v21 = vadd.f32 %v302_v20, %v184_v19 }
 0x107   :  { %v397_v22 = vpop.f32.mrf.mxu0 }
 0x108   :  { %v398_v37 = vadd.f32 %v397_v22, %v301_v30 }
 0x109   :  { %v399_v25 = vpop.f32.mrf.mxu0  ;;  %v479_v26 = vpop.f32.mrf.mxu1 }
 0x10a   :  { %v400_v27 = vadd.f32 %v399_v25, %v303_v21  ;;  %v480_v33 = vadd.f32 %v479_v26, %v390_v29 }
 0x10b   :  { %v481_v28 = vpop.f32.mrf.mxu1 }
 0x10c   :  { %v482_v31 = vadd.f32 %v481_v28, %v392_v17  ;;  %v584_v32 = vpop.f32.mrf.mxu0 }
 0x10d   :  { %v585_v39 = vadd.f32 %v584_v32, %v480_v33 }
 0x10e   :  { %v586_v34 = vpop.f32.mrf.mxu0 }
 0x10f   :  { %v488_v35 = vpop.f32.mrf.mxu1  ;;  %v587_v36 = vadd.f32 %v586_v34, %v482_v31 }
 0x110   :  { %v489_v40 = vadd.f32 %v488_v35, %v398_v37  ;;  %v591_v42 = vpop.f32.mrf.mxu0 }
 0x111   :  { %v490_v38 = vpop.f32.mrf.mxu1 }
 0x112   :  { %v5801_v41 = vadd.f32 %v490_v38, %v400_v27  ;;  %v592_v46 = vadd.f32 %v591_v42, %v489_v40  ;;  %v5897_v40 = vpop.f32.mrf.mxu0 }
 0x113   :  { %v671_v43 = vpop.f32.mrf.mxu1 }
 0x114   :  { %v5803_v44 = vadd.f32 %v671_v43, %v585_v39 }
 0x115   :  { %v673_v45 = vpop.f32.mrf.mxu1 }
 0x116   :  { %v5805_v47 = vadd.f32 %v673_v45, %v587_v36  ;;  %v692_v48 = vsel %vm691_vm1, %v5803_v44, 0 }
 0x117   :  { %v678_v49 = vpop.f32.mrf.mxu1  ;;  %v5809_v50 = vand.u32 4294901760, %v692_v48 }
 0x118   :  { %v5811_v51 = vadd.f32 %v678_v49, %v592_v46 }
 0x119   :  { %5134 = vmatprep.mubr.f32.mxu1 %v5809_v50  ;;  %v5815_v52 = vsub.f32 %v692_v48, %v5809_v50  ;;  %v5899_v42 = vpop.f32.mrf.mxu1 }
 0x11a   :  { %1231 = vrot.lane.b32.xlu1 %v5811_v51, %s5605_s2  ;;  %689 = vrot.lane.b32.xlu0 %v5811_v51, %s5606_s11  ;;  %v694_v56 = vsel %vm691_vm1, %v5811_v51, 0 }
 0x11b   :  { %v769_v53 = vand.u32 4294901760, %v5815_v52  ;;  %v5829_v57 = vand.u32 4294901760, %v694_v56 }
 0x11d   :  { %v770_v54 = vsub.f32 %v5815_v52, %v769_v53  ;;  %v5832_v58 = vsub.f32 %v694_v56, %v5829_v57 }
 0x11e   :  { %1229 = vrot.lane.b32.xlu1 %v5803_v44, %s5605_s2  ;;  %687 = vrot.lane.b32.xlu0 %v5803_v44, %s5606_s11 }
 0x11f   :  { %v771_v55 = vand.u32 4294901760, %v770_v54  ;;  %v779_v63 = vand.u32 4294901760, %v5832_v58 }
 0x121   :  { %5127 = vmatprep.mubr.f32.mxu0 %v771_v55  ;;  %v780_v5 = vsub.f32 %v5832_v58, %v779_v63 }
 0x122   :  { %1227 = vrot.lane.b32.xlu1 %v5811_v51, %s5607_s12  ;;  %1225 = vrot.lane.b32.xlu0 %v5803_v44, %s5607_s12 }
 0x123   :  { %v781_v12 = vand.u32 4294901760, %v780_v5 }
 0x18c   :  { %v690_v59 = vpop.permute.xlu0 %689  ;;  %v1232_v60 = vpop.permute.xlu1 %1231 }
 0x18d   :  { %v698_v61 = vsel %vm691_vm1, %v690_v59, 0  ;;  %v1239_v15 = vsel %vm691_vm1, %v1232_v60, 0  ;;  %v5901_v60 = vld [vmem:[#allocation7 + $0x8] sm:$0xff] }
 0x18e   :  { %v5835_v62 = vand.u32 4294901760, %v698_v61  ;;  %v5853_v19 = vand.u32 4294901760, %v1239_v15 }
 0x190   :  { %v817_v1 = vsub.f32 %v698_v61, %v5835_v62  ;;  %5123 = vmatprep.subr.mxu0 %v5835_v62  ;;  %v688_v2 = vpop.permute.xlu0 %687  ;;  %v1230_v7 = vpop.permute.xlu1 %1229  ;;  %v1358_v24 = vsub.f32 %v1239_v15, %v5853_v19 }
 0x191   :  { %v696_v3 = vsel %vm691_vm1, %v688_v2, 0  ;;  %5124 = vmatpush3.xpose.msra.mxu0 %v5835_v62  ;;  %v1237_v22 = vsel %vm691_vm1, %v1230_v7, 0 }
 0x192   :  { %v5842_v4 = vand.u32 4294901760, %v696_v3  ;;  %v818_v6 = vand.u32 4294901760, %v817_v1  ;;  %v5864_v25 = vand.u32 4294901760, %v1237_v22  ;;  %v1359_v28 = vand.u32 4294901760, %v1358_v24 }
 0x194   :  { %v824_v8 = vsub.f32 %v696_v3, %v5842_v4  ;;  %5125 = vmatprep.subr.mxu0 %v5842_v4  ;;  %v1226_v9 = vpop.permute.xlu0 %1225  ;;  %v819_v10 = vsub.f32 %v817_v1, %v818_v6  ;;  %v1228_v16 = vpop.permute.xlu1 %1227  ;;  %v1365_v29 = vsub.f32 %v1237_v22, %v5864_v25  ;;  %v1360_v32 = vsub.f32 %v1358_v24, %v1359_v28 }
 0x195   :  { %5126 = vmatpush3.xpose.msra.mxu0 %v5842_v4  ;;  %v1233_v11 = vsel %vm691_vm1, %v1226_v9, 0  ;;  %v1235_v20 = vsel %vm691_vm1, %v1228_v16, 0 }
 0x196   :  { %5137 = vmatprep.subr.mxu0 %v817_v1  ;;  %v820_v13 = vand.u32 4294901760, %v819_v10  ;;  %v825_v0 = vand.u32 4294901760, %v824_v8  ;;  %v5850_v17 = vand.u32 4294901760, %v1233_v11  ;;  %v5859_v23 = vand.u32 4294901760, %v1235_v20 }
 0x197   :  { %v1366_v34 = vand.u32 4294901760, %v1365_v29  ;;  %v1361_v36 = vand.u32 4294901760, %v1360_v32 }
 0x198   :  { %5128 = vmatmul.mubr.f32.vlgmr.msra.gmra.mxu0 %v781_v12  ;;  %5130 = vmatprep.subr.mxu1 %v820_v13  ;;  %v826_v14 = vsub.f32 %v824_v8, %v825_v0  ;;  %v1309_v21 = vsub.f32 %v1233_v11, %v5850_v17  ;;  %v1319_v27 = vsub.f32 %v1235_v20, %v5859_v23 }
 0x199   :  { %5131 = vmatpush3.xpose.msra.mxu1 %v820_v13  ;;  %5138 = vmatpush3.xpose.msra.mxu0 %v817_v1  ;;  %v1367_v37 = vsub.f32 %v1365_v29, %v1366_v34 }
 0x19a   :  { %5141 = vmatprep.mubr.f32.mxu0 %v5815_v52  ;;  %5139 = vmatprep.subr.mxu0 %v824_v8  ;;  %v827_v18 = vand.u32 4294901760, %v826_v14  ;;  %v1310_v26 = vand.u32 4294901760, %v1309_v21  ;;  %v1320_v31 = vand.u32 4294901760, %v1319_v27 }
 0x19b   :  { %v1368_v39 = vand.u32 4294901760, %v1367_v37 }
 0x19c   :  { %5132 = vmatprep.subr.mxu1 %v827_v18  ;;  %v1311_v30 = vsub.f32 %v1309_v21, %v1310_v26  ;;  %v1321_v35 = vsub.f32 %v1319_v27, %v1320_v31 }
 0x19d   :  { %5133 = vmatpush3.xpose.msra.mxu1 %v827_v18  ;;  %5140 = vmatpush3.xpose.msra.mxu0 %v824_v8 }
 0x19e   :  { %5144 = vmatprep.subr.mxu1 %v5835_v62  ;;  %5151 = vmatprep.subr.mxu0 %v818_v6  ;;  %v1312_v33 = vand.u32 4294901760, %v1311_v30  ;;  %v1322_v38 = vand.u32 4294901760, %v1321_v35 }
 0x1a0   :  { %5135 = vmatmul.mubr.f32.vlgmr.msra.gmra.mxu1 %v5829_v57  ;;  %5142 = vmatmul.mubr.f32.vlgmr.msra.gmra.mxu0 %v5832_v58 }
 0x1a1   :  { %5145 = vmatpush3.xpose.msra.mxu1 %v5835_v62  ;;  %5148 = vmatprep.mubr.f32.mxu1 %v769_v53 }
 0x1a2   :  { %5152 = vmatpush3.xpose.msra.mxu0 %v818_v6  ;;  %5155 = vmatprep.mubr.f32.mxu0 %v5809_v50 }
 0x1a3   :  { %5146 = vmatprep.subr.mxu1 %v5842_v4  ;;  %5153 = vmatprep.subr.mxu0 %v825_v0 }
 0x1a5   :  { %5147 = vmatpush3.xpose.msra.mxu1 %v5842_v4 }
 0x1a6   :  { %5154 = vmatpush3.xpose.msra.mxu0 %v825_v0  ;;  %5158 = vmatprep.subr.mxu1 %v5835_v62 }
 0x1a7   :  { %5165 = vmatprep.subr.mxu0 %v5853_v19 }
 0x1a8   :  { %5149 = vmatmul.mubr.f32.vlgmr.msra.gmra.mxu1 %v779_v63  ;;  %v5904_v63 = vld [vmem:[#allocation7] sm:$0xff] }
 0x1a9   :  { %5156 = vmatmul.mubr.f32.vlgmr.msra.gmra.mxu0 %v5829_v57  ;;  %5159 = vmatpush3.xpose.msra.mxu1 %v5835_v62 }
 0x1aa   :  { %5162 = vmatprep.mubr.f32.mxu1 %v5809_v50  ;;  %5166 = vmatpush3.xpose.msra.mxu0 %v5853_v19 }
 0x1ab   :  { %5169 = vmatprep.mubr.f32.mxu0 %v1312_v33  ;;  %5160 = vmatprep.subr.mxu1 %v5842_v4 }
 0x1ac   :  { %5167 = vmatprep.subr.mxu0 %v5864_v25 }
 0x1ad   :  { %5161 = vmatpush3.xpose.msra.mxu1 %v5842_v4 }
 0x1ae   :  { %5168 = vmatpush3.xpose.msra.mxu0 %v5864_v25  ;;  %5172 = vmatprep.subr.mxu1 %v1361_v36 }
 0x1af   :  { %5179 = vmatprep.subr.mxu0 %v1358_v24 }
 0x1b0   :  { %5163 = vmatmul.mubr.f32.vlgmr.msra.gmra.mxu1 %v5829_v57 }
 0x1b1   :  { %5170 = vmatmul.mubr.f32.vlgmr.msra.gmra.mxu0 %v1322_v38  ;;  %5173 = vmatpush3.xpose.msra.mxu1 %v1361_v36 }
 0x1b2   :  { %5176 = vmatprep.mubr.f32.mxu1 %v5850_v17  ;;  %5180 = vmatpush3.xpose.msra.mxu0 %v1358_v24 }
 0x1b3   :  { %5183 = vmatprep.mubr.f32.mxu0 %v1309_v21  ;;  %5174 = vmatprep.subr.mxu1 %v1368_v39 }
 0x1b4   :  { %5181 = vmatprep.subr.mxu0 %v1365_v29 }
 0x1b5   :  { %5175 = vmatpush3.xpose.msra.mxu1 %v1368_v39 }
 0x1b6   :  { %5182 = vmatpush3.xpose.msra.mxu0 %v1365_v29  ;;  %5186 = vmatprep.subr.mxu1 %v5853_v19 }
 0x1b7   :  { %5193 = vmatprep.subr.mxu0 %v1359_v28 }
 0x1b8   :  { %5177 = vmatmul.mubr.f32.vlgmr.msra.gmra.mxu1 %v5859_v23 }
 0x1b9   :  { %5184 = vmatmul.mubr.f32.vlgmr.msra.gmra.mxu0 %v1319_v27  ;;  %5187 = vmatpush3.xpose.msra.mxu1 %v5853_v19 }
 0x1ba   :  { %5190 = vmatprep.mubr.f32.mxu1 %v1310_v26  ;;  %5194 = vmatpush3.xpose.msra.mxu0 %v1359_v28 }
 0x1bb   :  { %5197 = vmatprep.mubr.f32.mxu0 %v5850_v17  ;;  %5188 = vmatprep.subr.mxu1 %v5864_v25 }
 0x1bc   :  { %5195 = vmatprep.subr.mxu0 %v1366_v34 }
 0x1bd   :  { %5189 = vmatpush3.xpose.msra.mxu1 %v5864_v25 }
 0x1be   :  { %5196 = vmatpush3.xpose.msra.mxu0 %v1366_v34  ;;  %5200 = vmatprep.subr.mxu1 %v5853_v19 }
 0x1c0   :  { %5191 = vmatmul.mubr.f32.vlgmr.msra.gmra.mxu1 %v1320_v31 }
 0x1c1   :  { %5198 = vmatmul.mubr.f32.vlgmr.msra.gmra.mxu0 %v5859_v23  ;;  %5201 = vmatpush3.xpose.msra.mxu1 %v5853_v19 }
 0x1c2   :  { %5204 = vmatprep.mubr.f32.mxu1 %v5850_v17  ;;  %5202 = vmatprep.subr.mxu1 %v5864_v25 }
 0x1c5   :  { %5203 = vmatpush3.xpose.msra.mxu1 %v5864_v25 }
 0x1c8   :  { %5205 = vmatmul.mubr.f32.vlgmr.msra.gmra.mxu1 %v5859_v23 }
 0x258   :  { %v5129_v43 = vpop.f32.mrf.mxu0 }
 0x259   :  { %v784_v12 = vadd.f32 %v5129_v43, %v5901_v60 }
 0x25a   :  { %v773_v46 = vpop.f32.mrf.mxu0 }
 0x25b   :  { %v774_v5 = vadd.f32 %v773_v46, %v5904_v63 }
 0x260   :  { %v5136_v45 = vpop.f32.mrf.mxu1  ;;  %v5143_v48 = vpop.f32.mrf.mxu0 }
 0x261   :  { %v871_v15 = vadd.f32 %v5136_v45, %v784_v12 }
 0x262   :  { %v864_v49 = vpop.f32.mrf.mxu1  ;;  %v946_v52 = vpop.f32.mrf.mxu0 }
 0x263   :  { %v865_v8 = vadd.f32 %v864_v49, %v774_v5  ;;  %v954_v22 = vadd.f32 %v5143_v48, %v871_v15 }
 0x265   :  { %v947_v16 = vadd.f32 %v946_v52, %v865_v8 }
 0x268   :  { %v5150_v50 = vpop.f32.mrf.mxu1 }
 0x269   :  { %v5157_v53 = vpop.f32.mrf.mxu0  ;;  %v1037_v26 = vadd.f32 %v5150_v50, %v954_v22 }
 0x26a   :  { %v1028_v54 = vpop.f32.mrf.mxu1 }
 0x26b   :  { %v1113_v56 = vpop.f32.mrf.mxu0  ;;  %v1029_v18 = vadd.f32 %v1028_v54, %v947_v16  ;;  %v1120_v32 = vadd.f32 %v5157_v53, %v1037_v26 }
 0x26d   :  { %v1114_v27 = vadd.f32 %v1113_v56, %v1029_v18 }
 0x270   :  { %v5164_v55 = vpop.f32.mrf.mxu1 }
 0x271   :  { %v5171_v57 = vpop.f32.mrf.mxu0  ;;  %v1199_v33 = vadd.f32 %v5164_v55, %v1120_v32 }
 0x272   :  { %v1192_v58 = vpop.f32.mrf.mxu1  ;;  %v1325_v62 = vadd.f32 %v5171_v57, %v5901_v60 }
 0x273   :  { %v1314_v61 = vpop.f32.mrf.mxu0  ;;  %v1193_v30 = vadd.f32 %v1192_v58, %v1114_v27  ;;  %v1206_v35 = vsel %vm1202_vm2, %v1199_v33, -inf }
 0x274   :  { %v1315_v2 = vadd.f32 %v1314_v61, %v5904_v63 }
 0x275   :  { %v1203_v34 = vsel %vm1202_vm2, %v1193_v30, -inf }
 0x278   :  { %v5178_v59 = vpop.f32.mrf.mxu1 }
 0x279   :  { %v1412_v3 = vadd.f32 %v5178_v59, %v1325_v62  ;;  %v5185_v4 = vpop.f32.mrf.mxu0 }
 0x27a   :  { %v1405_v1 = vpop.f32.mrf.mxu1 }
 0x27b   :  { %v1406_v6 = vadd.f32 %v1405_v1, %v1315_v2  ;;  %v1495_v9 = vadd.f32 %v5185_v4, %v1412_v3  ;;  %v1487_v10 = vpop.f32.mrf.mxu0 }
 0x27d   :  { %v1488_v13 = vadd.f32 %v1487_v10, %v1406_v6 }
 0x280   :  { %v5192_v7 = vpop.f32.mrf.mxu1 }
 0x281   :  { %v1578_v0 = vadd.f32 %v5192_v7, %v1495_v9  ;;  %v5199_v14 = vpop.f32.mrf.mxu0 }
 0x282   :  { %v1569_v11 = vpop.f32.mrf.mxu1 }
 0x283   :  { %v1570_v17 = vadd.f32 %v1569_v11, %v1488_v13  ;;  %v1661_v19 = vadd.f32 %v5199_v14, %v1578_v0  ;;  %v1654_v20 = vpop.f32.mrf.mxu0 }
 0x285   :  { %v1655_v23 = vadd.f32 %v1654_v20, %v1570_v17 }
 0x288   :  { %v5206_v21 = vpop.f32.mrf.mxu1 }
 0x289   :  { %v1740_v24 = vadd.f32 %v5206_v21, %v1661_v19 }
 0x28a   :  { %v1733_v25 = vpop.f32.mrf.mxu1 }
 0x28b   :  { %v1734_v28 = vadd.f32 %v1733_v25, %v1655_v23  ;;  %v1746_v29 = vsel %vm1202_vm2, %v1740_v24, -inf }
 0x28c   :  { %1747 = vmax.xlane.f32.xlu1 %v1746_v29 }
 0x28d   :  { %v1743_v31 = vsel %vm1202_vm2, %v1734_v28, -inf }
 0x28e   :  { %1744 = vmax.xlane.f32.xlu0 %v1743_v31 }
 0x292   :  { %1204 = vmax.xlane.f32.xlu0 %v1203_v34 }
 0x296   :  { %1207 = vmax.xlane.f32.xlu0 %v1206_v35 }
 0x315   :  { %v1748_v38 = vpop.xlane.xlu1 %1747 }
 0x316   :  { %v1750_v45 = vsub.f32 %v1740_v24, %v1748_v38 }
 0x317   :  { %v1745_v36 = vpop.xlane.xlu0 %1744 }
 0x318   :  { %v1749_v37 = vsub.f32 %v1734_v28, %v1745_v36  ;;  %v1753_v52 = vmul.f32 1.442695, %v1750_v45 }
 0x31a   :  { %v1751_v46 = vmul.f32 1.442695, %v1749_v37 }
 0x31b   :  { %v1205_v39 = vpop.xlane.xlu0 %1204 }
 0x31c   :  { %v1209_v43 = vsub.f32 %v1193_v30, %v1205_v39 }
 0x31e   :  { %v1211_v48 = vmul.f32 1.442695, %v1209_v43 }
 0x31f   :  { %v1208_v49 = vpop.xlane.xlu0 %1207 }
 0x320   :  { %5477 = vpow2.f32 %v1211_v48  ;;  %v1210_v50 = vsub.f32 %v1199_v33, %v1208_v49 }
 0x321   :  { %5479 = vpow2.f32 %v1751_v46 }
 0x322   :  { %v1213_v53 = vmul.f32 1.442695, %v1210_v50 }
 0x324   :  { %5481 = vpow2.f32 %v1213_v53 }
 0x325   :  { %5483 = vpow2.f32 %v1753_v52 }
 0x32d   :  { %v5913_v54 = vpop.eup %5477 }
 0x32e   :  { %v1215_v55 = vsel %vm1202_vm2, %v5913_v54, 0.0  ;;  %v5480_v56 = vpop.eup %5479 }
 0x32f   :  { %1216 = vadd.xlane.f32.xlu1 %v1215_v55  ;;  %v1755_v58 = vsel %vm1202_vm2, %v5480_v56, 0.0 }
 0x331   :  { %v5917_v57 = vpop.eup %5481 }
 0x332   :  { %v1218_v59 = vsel %vm1202_vm2, %v5917_v57, 0.0  ;;  %v5484_v61 = vpop.eup %5483 }
 0x333   :  { %1756 = vadd.xlane.f32.xlu1 %v1755_v58  ;;  %1219 = vadd.xlane.f32.xlu0 %v1218_v59  ;;  %v1758_v62 = vsel %vm1202_vm2, %v5484_v61, 0.0 }
 0x337   :  { %1759 = vadd.xlane.f32.xlu0 %v1758_v62 }
 0x344   :  { %1767 = vrot.lane.b32.xlu1 %v5811_v51, %s5608_s13 }
 0x348   :  { %2281 = vrot.lane.b32.xlu1 %v5811_v51, %s5609_s14 }
 0x34c   :  { %2279 = vrot.lane.b32.xlu1 %v5803_v44, %s5609_s14 }
 0x34d   :  { %1765 = vrot.lane.b32.xlu0 %v5803_v44, %s5608_s13 }
 0x350   :  { %2797 = vrot.lane.b32.xlu1 %v5803_v44, %s5610_s15 }
 0x351   :  { %2799 = vrot.lane.b32.xlu0 %v5811_v51, %s5610_s15 }
 0x354   :  { %2795 = vrot.lane.b32.xlu1 %v5811_v51, %s5611_s16 }
 0x355   :  { %2793 = vrot.lane.b32.xlu0 %v5803_v44, %s5611_s16 }
 0x3b8   :  { %v1217_v1 = vpop.xlane.xlu1 %1216 }
 0x3bc   :  { %v1757_v2 = vpop.xlane.xlu1 %1756  ;;  %v1220_v3 = vpop.xlane.xlu0 %1219 }
 0x3bd   :  { %5485 = vrcp.f32 %v1757_v2 }
 0x3be   :  { %5487 = vrcp.f32 %v1217_v1 }
 0x3c0   :  { %v1768_v4 = vpop.permute.xlu1 %1767  ;;  %v1760_v5 = vpop.xlane.xlu0 %1759 }
 0x3c1   :  { %v5931_v6 = vand.u32 4294901760, %v1768_v4  ;;  %5489 = vrcp.f32 %v1760_v5 }
 0x3c2   :  { %5491 = vrcp.f32 %v1220_v3 }
 0x3c3   :  { %v5934_v7 = vsub.f32 %v1768_v4, %v5931_v6  ;;  %5207 = vmatprep.subr.mxu0 %v5931_v6 }
 0x3c4   :  { %5208 = vmatpush3.msra.mxu0 %v5931_v6  ;;  %v1766_v8 = vpop.permute.xlu0 %1765  ;;  %v2282_v9 = vpop.permute.xlu1 %2281 }
 0x3c5   :  { %v5938_v10 = vand.u32 4294901760, %v1766_v8  ;;  %v5941_v11 = vand.u32 4294901760, %v5934_v7  ;;  %v5954_v16 = vand.u32 4294901760, %v2282_v9 }
 0x3c7   :  { %v5944_v12 = vsub.f32 %v1766_v8, %v5938_v10  ;;  %5209 = vmatprep.subr.mxu0 %v5938_v10  ;;  %v1896_v13 = vsub.f32 %v5934_v7, %v5941_v11  ;;  %v5964_v26 = vsub.f32 %v2282_v9, %v5954_v16 }
 0x3c8   :  { %5210 = vmatpush3.msra.mxu0 %v5938_v10  ;;  %v2280_v17 = vpop.permute.xlu1 %2279  ;;  %v2800_v39 = vpop.permute.xlu0 %2799 }
 0x3c9   :  { %5221 = vmatprep.subr.mxu0 %v5934_v7  ;;  %v1897_v0 = vand.u32 4294901760, %v1896_v13  ;;  %v5952_v14 = vand.u32 4294901760, %v5944_v12  ;;  %v5959_v24 = vand.u32 4294901760, %v2280_v17  ;;  %v5977_v35 = vand.u32 4294901760, %v5964_v26 }
 0x3ca   :  { %v5486_v15 = vpop.eup %5485  ;;  %v2807_v52 = vsel %vm691_vm1, %v2800_v39, 0 }
 0x3cb   :  { %5214 = vmatprep.subr.mxu1 %v1897_v0  ;;  %v1903_v18 = vsub.f32 %v5944_v12, %v5952_v14  ;;  %v1762_v19 = vmul.f32 %v5486_v15, %v5480_v56  ;;  %v5488_v20 = vpop.eup %5487  ;;  %v5972_v31 = vsub.f32 %v2280_v17, %v5959_v24  ;;  %v2410_v49 = vsub.f32 %v5964_v26, %v5977_v35 }
 0x3cc   :  { %5215 = vmatpush3.msra.mxu1 %v1897_v0  ;;  %v1222_v30 = vmul.f32 %v5488_v20, %v5913_v54  ;;  %v2798_v54 = vpop.permute.xlu1 %2797  ;;  %v6001_v59 = vand.u32 4294901760, %v2807_v52 }
 0x3cd   :  { %v1904_v21 = vand.u32 4294901760, %v1903_v18  ;;  %v1772_v22 = vsel %vm1202_vm2, %v1762_v19, 0  ;;  %v5985_v46 = vand.u32 4294901760, %v5972_v31  ;;  %v2411_v58 = vand.u32 4294901760, %v2410_v49 }
 0x3ce   :  { %v5490_v23 = vpop.eup %5489  ;;  %v5961_v25 = vand.u32 4294901760, %v1772_v22  ;;  %v2286_v38 = vsel %vm1202_vm2, %v1222_v30, 0  ;;  %v6014_v3 = vsub.f32 %v2807_v52, %v6001_v59  ;;  %v6092_v30 = vand.u32 4294901760, %v5805_v47 }
 0x3cf   :  { %5216 = vmatprep.subr.mxu1 %v1904_v21  ;;  %v1764_v27 = vmul.f32 %v5490_v23, %v5484_v61  ;;  %v5492_v34 = vpop.eup %5491  ;;  %v5993_v53 = vand.u32 4294901760, %v2286_v38  ;;  %v2417_v56 = vsub.f32 %v5972_v31, %v5985_v46  ;;  %v2805_v61 = vsel %vm691_vm1, %v2798_v54, 0 }
 0x3d0   :  { %5218 = vmatprep.mubr.f32.mxu1 %v5961_v25  ;;  %5217 = vmatpush3.msra.mxu1 %v1904_v21  ;;  %v1845_v28 = vsub.f32 %v1772_v22, %v5961_v25  ;;  %v1224_v48 = vmul.f32 %v5492_v34, %v5917_v57  ;;  %v6016_v4 = vand.u32 4294901760, %v2805_v61  ;;  %v6031_v9 = vand.u32 4294901760, %v6014_v3  ;;  %v2796_v17 = vpop.permute.xlu1 %2795 }
 0x3d1   :  { %5228 = vmatprep.subr.mxu1 %v5931_v6  ;;  %v1775_v29 = vsel %vm1202_vm2, %v1764_v27, 0  ;;  %v6009_v1 = vsub.f32 %v2286_v38, %v5993_v53  ;;  %v2418_v2 = vand.u32 4294901760, %v2417_v56  ;;  %v2803_v19 = vsel %vm691_vm1, %v2796_v17, 0 }
 0x3d2   :  { %v5974_v32 = vand.u32 4294901760, %v1775_v29  ;;  %v1846_v33 = vand.u32 4294901760, %v1845_v28  ;;  %v2289_v57 = vsel %vm1202_vm2, %v1224_v48, 0  ;;  %v6026_v8 = vsub.f32 %v2805_v61, %v6016_v4 }
 0x3d3   :  { %v6006_v62 = vand.u32 4294901760, %v2289_v57  ;;  %v594_v23 = vadd.f32 %v5897_v40, %v5801_v41  ;;  %v6104_v34 = vsub.f32 %v5805_v47, %v6092_v30 }
 0x3d4   :  { %v1855_v36 = vsub.f32 %v1775_v29, %v5974_v32  ;;  %5219 = vmatmul.mubr.f32.vlgmr.msra.gmra.mxu1 %v5974_v32  ;;  %v1847_v37 = vsub.f32 %v1845_v28, %v1846_v33  ;;  %v6045_v0 = vand.u32 4294901760, %v6026_v8 }
 0x3d5   :  { %5229 = vmatpush3.msra.mxu1 %v5931_v6  ;;  %5232 = vmatprep.mubr.f32.mxu1 %v1846_v33  ;;  %v2369_v5 = vsub.f32 %v2289_v57, %v6006_v62  ;;  %v6068_v27 = vadd.f32 %v5899_v42, %v594_v23 }
 0x3d6   :  { %5230 = vmatprep.subr.mxu1 %v5938_v10  ;;  %v1848_v43 = vand.u32 4294901760, %v1847_v37  ;;  %v1856_v45 = vand.u32 4294901760, %v1855_v36  ;;  %v2935_v21 = vsub.f32 %v6026_v8, %v6045_v0  ;;  %v6114_v37 = vand.u32 4294901760, %v6104_v34 }
 0x3d7   :  { %5231 = vmatpush3.msra.mxu1 %v5938_v10 }
 0x3d8   :  { %5242 = vmatprep.subr.mxu1 %v5931_v6  ;;  %5211 = vmatprep.mubr.f32.mxu0 %v1848_v43  ;;  %v1857_v50 = vsub.f32 %v1855_v36, %v1856_v45  ;;  %v3465_v39 = vsub.f32 %v6104_v34, %v6114_v37 }
 0x3d9   :  { %5233 = vmatmul.mubr.f32.vlgmr.msra.gmra.mxu1 %v1856_v45 }
 0x3da   :  { %5243 = vmatpush3.msra.mxu1 %v5931_v6  ;;  %5246 = vmatprep.mubr.f32.mxu1 %v5961_v25  ;;  %v1858_v55 = vand.u32 4294901760, %v1857_v50  ;;  %v2360_v6 = vand.u32 4294901760, %v6009_v1  ;;  %v3466_v43 = vand.u32 4294901760, %v3465_v39 }
 0x3db   :  { %5244 = vmatprep.subr.mxu1 %v5938_v10 }
 0x3dc   :  { %5245 = vmatpush3.msra.mxu1 %v5938_v10  ;;  %5212 = vmatmul.mubr.f32.vlgmr.msra.gmra.mxu0 %v1858_v55  ;;  %v2370_v10 = vand.u32 4294901760, %v2369_v5 }
 0x3dd   :  { %5256 = vmatprep.subr.mxu1 %v2411_v58  ;;  %5222 = vmatpush3.msra.mxu0 %v5934_v7  ;;  %v2794_v7 = vpop.permute.xlu0 %2793 }
 0x3de   :  { %5247 = vmatmul.mubr.f32.vlgmr.msra.gmra.mxu1 %v5974_v32  ;;  %5223 = vmatprep.subr.mxu0 %v5944_v12  ;;  %v2801_v13 = vsel %vm691_vm1, %v2794_v7, 0 }
 0x3df   :  { %5257 = vmatpush3.msra.mxu1 %v2411_v58  ;;  %5225 = vmatprep.mubr.f32.mxu0 %v1845_v28  ;;  %v6047_v15 = vand.u32 4294901760, %v2801_v13  ;;  %v2936_v28 = vand.u32 4294901760, %v2935_v21 }
 0x3e0   :  { %5258 = vmatprep.subr.mxu1 %v2418_v2  ;;  %5260 = vmatprep.mubr.f32.mxu1 %v5993_v53 }
 0x3e1   :  { %5224 = vmatpush3.msra.mxu0 %v5944_v12  ;;  %5259 = vmatpush3.msra.mxu1 %v2418_v2  ;;  %v2361_v12 = vsub.f32 %v6009_v1, %v2360_v6  ;;  %v2877_v22 = vsub.f32 %v2801_v13, %v6047_v15 }
 0x3e2   :  { %5235 = vmatprep.subr.mxu0 %v5941_v11  ;;  %5270 = vmatprep.subr.mxu1 %v5954_v16 }
 0x3e3   :  { %5226 = vmatmul.mubr.f32.vlgmr.msra.gmra.mxu0 %v1855_v36  ;;  %5261 = vmatmul.mubr.f32.vlgmr.msra.gmra.mxu1 %v6006_v62  ;;  %v2362_v18 = vand.u32 4294901760, %v2361_v12  ;;  %v2878_v41 = vand.u32 4294901760, %v2877_v22 }
 0x3e4   :  { %5236 = vmatpush3.msra.mxu0 %v5941_v11  ;;  %5271 = vmatpush3.msra.mxu1 %v5954_v16  ;;  %v2928_v11 = vsub.f32 %v6014_v3, %v6031_v9 }
 0x3e5   :  { %5237 = vmatprep.subr.mxu0 %v5952_v14  ;;  %5239 = vmatprep.mubr.f32.mxu0 %v5961_v25  ;;  %v6064_v25 = vand.u32 4294901760, %v2803_v19  ;;  %v2879_v42 = vsub.f32 %v2877_v22, %v2878_v41 }
 0x3e6   :  { %5272 = vmatprep.subr.mxu1 %v5959_v24  ;;  %5274 = vmatprep.mubr.f32.mxu1 %v2360_v6  ;;  %v2929_v20 = vand.u32 4294901760, %v2928_v11 }
 0x3e7   :  { %5238 = vmatpush3.msra.mxu0 %v5952_v14  ;;  %5273 = vmatpush3.msra.mxu1 %v5959_v24  ;;  %v2371_v14 = vsub.f32 %v2369_v5, %v2370_v10  ;;  %v2887_v40 = vsub.f32 %v2803_v19, %v6064_v25 }
 0x3e8   :  { %5249 = vmatprep.subr.mxu0 %v5954_v16  ;;  %5284 = vmatprep.subr.mxu1 %v5954_v16 }
 0x3e9   :  { %5240 = vmatmul.mubr.f32.vlgmr.msra.gmra.mxu0 %v5974_v32  ;;  %5275 = vmatmul.mubr.f32.vlgmr.msra.gmra.mxu1 %v2370_v10 }
 0x3ea   :  { %5250 = vmatpush3.msra.mxu0 %v5954_v16  ;;  %5285 = vmatpush3.msra.mxu1 %v5954_v16  ;;  %v2372_v16 = vand.u32 4294901760, %v2371_v14 }
 0x3eb   :  { %5251 = vmatprep.subr.mxu0 %v5959_v24  ;;  %5253 = vmatprep.mubr.f32.mxu0 %v2362_v18 }
 0x3ec   :  { %5286 = vmatprep.subr.mxu1 %v5959_v24  ;;  %5288 = vmatprep.mubr.f32.mxu1 %v5993_v53 }
 0x3ed   :  { %5252 = vmatpush3.msra.mxu0 %v5959_v24  ;;  %5287 = vmatpush3.msra.mxu1 %v5959_v24  ;;  %v6077_v24 = vand.u32 4294901760, %v6068_v27 }
 0x3ee   :  { %5263 = vmatprep.subr.mxu0 %v5964_v26  ;;  %5298 = vmatprep.subr.mxu1 %v2929_v20 }
 0x3ef   :  { %5254 = vmatmul.mubr.f32.vlgmr.msra.gmra.mxu0 %v2372_v16  ;;  %5289 = vmatmul.mubr.f32.vlgmr.msra.gmra.mxu1 %v6006_v62  ;;  %v6087_v29 = vsub.f32 %v6068_v27, %v6077_v24 }
 0x3f0   :  { %5264 = vmatpush3.msra.mxu0 %v5964_v26  ;;  %5299 = vmatpush3.xpose.msra.mxu1 %v2929_v20  ;;  %v2888_v26 = vand.u32 4294901760, %v2887_v40 }
 0x3f1   :  { %5265 = vmatprep.subr.mxu0 %v5972_v31  ;;  %5267 = vmatprep.mubr.f32.mxu0 %v6009_v1  ;;  %v6100_v33 = vand.u32 4294901760, %v6087_v29 }
 0x3f2   :  { %5300 = vmatprep.subr.mxu1 %v2936_v28  ;;  %5302 = vmatprep.mubr.f32.mxu1 %v6047_v15  ;;  %v2889_v32 = vsub.f32 %v2887_v40, %v2888_v26 }
 0x3f3   :  { %5266 = vmatpush3.msra.mxu0 %v5972_v31  ;;  %v2880_v31 = vand.u32 4294901760, %v2879_v42  ;;  %v3458_v36 = vsub.f32 %v6087_v29, %v6100_v33 }
 0x3f4   :  { %5277 = vmatprep.subr.mxu0 %v5977_v35  ;;  %5268 = vmatmul.mubr.f32.vlgmr.msra.gmra.mxu0 %v2369_v5 }
 0x3f5   :  { %5278 = vmatpush3.msra.mxu0 %v5977_v35  ;;  %5301 = vmatpush3.xpose.msra.mxu1 %v2936_v28  ;;  %v2890_v35 = vand.u32 4294901760, %v2889_v32  ;;  %v3459_v38 = vand.u32 4294901760, %v3458_v36 }
 0x3f6   :  { %5279 = vmatprep.subr.mxu0 %v5985_v46  ;;  %5281 = vmatprep.mubr.f32.mxu0 %v5993_v53 }
 0x3f7   :  { %5312 = vmatprep.subr.mxu1 %v6001_v59  ;;  %5280 = vmatpush3.msra.mxu0 %v5985_v46 }
 0x3f8   :  { %5291 = vmatprep.subr.mxu0 %v6001_v59  ;;  %5303 = vmatmul.mubr.f32.vlgmr.msra.gmra.mxu1 %v6064_v25 }
 0x3f9   :  { %5282 = vmatmul.mubr.f32.vlgmr.msra.gmra.mxu0 %v6006_v62  ;;  %5313 = vmatpush3.xpose.msra.mxu1 %v6001_v59 }
 0x3fa   :  { %5292 = vmatpush3.xpose.msra.mxu0 %v6001_v59  ;;  %5316 = vmatprep.mubr.f32.mxu1 %v2878_v41 }
 0x3fb   :  { %5293 = vmatprep.subr.mxu0 %v6016_v4  ;;  %5295 = vmatprep.mubr.f32.mxu0 %v2880_v31 }
 0x3fc   :  { %5314 = vmatprep.subr.mxu1 %v6016_v4 }
 0x3fd   :  { %5315 = vmatpush3.xpose.msra.mxu1 %v6016_v4 }
 0x3fe   :  { %5294 = vmatpush3.xpose.msra.mxu0 %v6016_v4  ;;  %5326 = vmatprep.subr.mxu1 %v6001_v59 }
 0x3ff   :  { %5305 = vmatprep.subr.mxu0 %v6014_v3 }
 0x400   :  { %5317 = vmatmul.mubr.f32.vlgmr.msra.gmra.mxu1 %v2888_v26 }
 0x401   :  { %5296 = vmatmul.mubr.f32.vlgmr.msra.gmra.mxu0 %v2890_v35  ;;  %5327 = vmatpush3.xpose.msra.mxu1 %v6001_v59 }
 0x402   :  { %5306 = vmatpush3.xpose.msra.mxu0 %v6014_v3  ;;  %5309 = vmatprep.mubr.f32.mxu0 %v2877_v22 }
 0x403   :  { %5330 = vmatprep.mubr.f32.mxu1 %v6047_v15  ;;  %5307 = vmatprep.subr.mxu0 %v6026_v8 }
 0x404   :  { %5328 = vmatprep.subr.mxu1 %v6016_v4 }
 0x405   :  { %5329 = vmatpush3.xpose.msra.mxu1 %v6016_v4 }
 0x406   :  { %5308 = vmatpush3.xpose.msra.mxu0 %v6026_v8  ;;  %5340 = vmatprep.subr.mxu1 %v3459_v38 }
 0x407   :  { %5319 = vmatprep.subr.mxu0 %v6031_v9 }
 0x408   :  { %5331 = vmatmul.mubr.f32.vlgmr.msra.gmra.mxu1 %v6064_v25 }
 0x409   :  { %5310 = vmatmul.mubr.f32.vlgmr.msra.gmra.mxu0 %v2887_v40  ;;  %5341 = vmatpush3.msra.mxu1 %v3459_v38 }
 0x40a   :  { %5320 = vmatpush3.xpose.msra.mxu0 %v6031_v9  ;;  %5323 = vmatprep.mubr.f32.mxu0 %v6047_v15 }
 0x40b   :  { %5321 = vmatprep.subr.mxu0 %v6045_v0  ;;  %5342 = vmatprep.subr.mxu1 %v3466_v43 }
 0x40c   :  { %5343 = vmatpush3.msra.mxu1 %v3466_v43 }
 0x40d   :  { %5354 = vmatprep.subr.mxu1 %v6077_v24 }
 0x40e   :  { %5322 = vmatpush3.xpose.msra.mxu0 %v6045_v0 }
 0x40f   :  { %5333 = vmatprep.subr.mxu0 %v6077_v24 }
 0x411   :  { %5324 = vmatmul.mubr.f32.vlgmr.msra.gmra.mxu0 %v6064_v25 }
 0x412   :  { %5334 = vmatpush3.msra.mxu0 %v6077_v24 }
 0x413   :  { %5335 = vmatprep.subr.mxu0 %v6092_v30 }
 0x414   :  { %5336 = vmatpush3.msra.mxu0 %v6092_v30 }
 0x415   :  { %5347 = vmatprep.subr.mxu0 %v6087_v29 }
 0x494   :  { %v5220_v45 = vpop.f32.mrf.mxu1 }
 0x496   :  { %v1941_v46 = vpop.f32.mrf.mxu1 }
 0x499   :  { %v5234_v48 = vpop.f32.mrf.mxu1 }
 0x49b   :  { %v2105_v50 = vpop.f32.mrf.mxu1 }
 0x49c   :  { %v5213_v49 = vpop.f32.mrf.mxu0 }
 0x49d   :  { %v1948_v52 = vadd.f32 %v5220_v45, %v5213_v49 }
 0x49e   :  { %v1850_v53 = vpop.f32.mrf.mxu0  ;;  %v5248_v55 = vpop.f32.mrf.mxu1 }
 0x49f   :  { %v1942_v54 = vadd.f32 %v1941_v46, %v1850_v53 }
 0x4a0   :  { %v2269_v58 = vpop.f32.mrf.mxu1 }
 0x4a3   :  { %v5227_v56 = vpop.f32.mrf.mxu0  ;;  %v5262_v2 = vpop.f32.mrf.mxu1 }
 0x4a4   :  { %v2031_v57 = vadd.f32 %v5227_v56, %v1948_v52 }
 0x4a5   :  { %v2023_v59 = vpop.f32.mrf.mxu0  ;;  %v2455_v8 = vpop.f32.mrf.mxu1 }
 0x4a6   :  { %v2024_v61 = vadd.f32 %v2023_v59, %v1942_v54  ;;  %v2114_v62 = vadd.f32 %v5234_v48, %v2031_v57 }
 0x4a8   :  { %v2106_v1 = vadd.f32 %v2105_v50, %v2024_v61 }
 0x4a9   :  { %v5241_v3 = vpop.f32.mrf.mxu0  ;;  %v5276_v13 = vpop.f32.mrf.mxu1 }
 0x4aa   :  { %v2197_v4 = vadd.f32 %v5241_v3, %v2114_v62 }
 0x4ab   :  { %v2190_v5 = vpop.f32.mrf.mxu0  ;;  %v2619_v14 = vpop.f32.mrf.mxu1 }
 0x4ac   :  { %v2191_v6 = vadd.f32 %v2190_v5, %v2106_v1  ;;  %v2276_v7 = vadd.f32 %v5248_v55, %v2197_v4 }
 0x4ae   :  { %v2270_v9 = vadd.f32 %v2269_v58, %v2191_v6 }
 0x4af   :  { %v5255_v10 = vpop.f32.mrf.mxu0  ;;  %v5290_v16 = vpop.f32.mrf.mxu1 }
 0x4b0   :  { %v2375_v12 = vadd.f32 %v5255_v10, %v2276_v7 }
 0x4b1   :  { %v2364_v11 = vpop.f32.mrf.mxu0  ;;  %v2783_v26 = vpop.f32.mrf.mxu1 }
 0x4b2   :  { %v2365_v0 = vadd.f32 %v2364_v11, %v2270_v9  ;;  %v2462_v15 = vadd.f32 %v5262_v2, %v2375_v12 }
 0x4b4   :  { %v5269_v17 = vpop.f32.mrf.mxu0  ;;  %v2456_v18 = vadd.f32 %v2455_v8, %v2365_v0 }
 0x4b5   :  { %v2545_v19 = vadd.f32 %v5269_v17, %v2462_v15 }
 0x4b6   :  { %v2537_v20 = vpop.f32.mrf.mxu0 }
 0x4b7   :  { %v2538_v21 = vadd.f32 %v2537_v20, %v2456_v18  ;;  %v2628_v22 = vadd.f32 %v5276_v13, %v2545_v19 }
 0x4b8   :  { %v5304_v35 = vpop.f32.mrf.mxu1 }
 0x4b9   :  { %v5283_v23 = vpop.f32.mrf.mxu0  ;;  %v2620_v25 = vadd.f32 %v2619_v14, %v2538_v21 }
 0x4ba   :  { %v2711_v28 = vadd.f32 %v5283_v23, %v2628_v22  ;;  %v2973_v43 = vpop.f32.mrf.mxu1 }
 0x4bb   :  { %v2704_v41 = vpop.f32.mrf.mxu0 }
 0x4bc   :  { %v6137_v40 = vadd.f32 %v5290_v16, %v2711_v28  ;;  %v2705_v42 = vadd.f32 %v2704_v41, %v2620_v25 }
 0x4be   :  { %v6139_v31 = vadd.f32 %v2783_v26, %v2705_v42 }
 0x4c0   :  { %v5318_v48 = vpop.f32.mrf.mxu1 }
 0x4c1   :  { %v5297_v32 = vpop.f32.mrf.mxu0 }
 0x4c2   :  { %v2893_v38 = vadd.f32 %v5297_v32, %v5901_v60  ;;  %v3137_v54 = vpop.f32.mrf.mxu1 }
 0x4c3   :  { %v2882_v36 = vpop.f32.mrf.mxu0 }
 0x4c4   :  { %v2883_v39 = vadd.f32 %v2882_v36, %v5904_v63  ;;  %v2980_v46 = vadd.f32 %v5304_v35, %v2893_v38 }
 0x4c6   :  { %v2974_v52 = vadd.f32 %v2973_v43, %v2883_v39 }
 0x4c8   :  { %v5332_v56 = vpop.f32.mrf.mxu1 }
 0x4c9   :  { %v5311_v45 = vpop.f32.mrf.mxu0 }
 0x4ca   :  { %v3063_v50 = vadd.f32 %v5311_v45, %v2980_v46  ;;  %v3301_v60 = vpop.f32.mrf.mxu1 }
 0x4cb   :  { %v3055_v49 = vpop.f32.mrf.mxu0 }
 0x4cc   :  { %v3056_v53 = vadd.f32 %v3055_v49, %v2974_v52  ;;  %v3146_v55 = vadd.f32 %v5318_v48, %v3063_v50 }
 0x4ce   :  { %v3138_v59 = vadd.f32 %v3137_v54, %v3056_v53 }
 0x4d1   :  { %v5325_v57 = vpop.f32.mrf.mxu0 }
 0x4d2   :  { %v3229_v58 = vadd.f32 %v5325_v57, %v3146_v55 }
 0x4d3   :  { %v3222_v61 = vpop.f32.mrf.mxu0 }
 0x4d4   :  { %v3223_v62 = vadd.f32 %v3222_v61, %v3138_v59  ;;  %v3308_v1 = vadd.f32 %v5332_v56, %v3229_v58 }
 0x4d6   :  { %v3314_v63 = vsel %vm1202_vm2, %v3308_v1, -inf  ;;  %v3302_v2 = vadd.f32 %v3301_v60, %v3223_v62 }
 0x4d7   :  { %3315 = vmax.xlane.f32.xlu1 %v3314_v63 }
 0x4d8   :  { %v3311_v3 = vsel %vm1202_vm2, %v3302_v2, -inf }
 0x4d9   :  { %3312 = vmax.xlane.f32.xlu0 %v3311_v3 }
 0x4e8   :  { %3849 = vrot.lane.b32.xlu1 %v5811_v51, %s5612_s17 }
 0x4ec   :  { %3843 = vrot.lane.b32.xlu1 %v5803_v44, %s5613_s18 }
 0x4f0   :  { %3845 = vrot.lane.b32.xlu1 %v5811_v51, %s5613_s18 }
 0x560   :  { %v3316_v4 = vpop.xlane.xlu1 %3315 }
 0x561   :  { %v3318_v5 = vsub.f32 %v3308_v1, %v3316_v4 }
 0x562   :  { %v3313_v6 = vpop.xlane.xlu0 %3312 }
 0x563   :  { %v3317_v7 = vsub.f32 %v3302_v2, %v3313_v6  ;;  %v3321_v8 = vmul.f32 1.442695, %v3318_v5 }
 0x564   :  { %v3850_v15 = vpop.permute.xlu1 %3849 }
 0x565   :  { %v3319_v9 = vmul.f32 1.442695, %v3317_v7  ;;  %v3857_v17 = vsel %vm691_vm1, %v3850_v15, 0 }
 0x566   :  { %v6152_v19 = vand.u32 4294901760, %v3857_v17 }
 0x567   :  { %5493 = vpow2.f32 %v3319_v9 }
 0x568   :  { %5495 = vpow2.f32 %v3321_v8  ;;  %v6159_v25 = vsub.f32 %v3857_v17, %v6152_v19  ;;  %v3844_v42 = vpop.permute.xlu1 %3843 }
 0x569   :  { %v3851_v39 = vsel %vm691_vm1, %v3844_v42, 0 }
 0x56a   :  { %v6166_v38 = vand.u32 4294901760, %v6159_v25  ;;  %v6174_v50 = vand.u32 4294901760, %v3851_v39 }
 0x56c   :  { %v3846_v52 = vpop.permute.xlu1 %3845  ;;  %v3978_v53 = vsub.f32 %v6159_v25, %v6166_v38  ;;  %v3927_v58 = vsub.f32 %v3851_v39, %v6174_v50 }
 0x56d   :  { %v3853_v55 = vsel %vm691_vm1, %v3846_v52, 0 }
 0x56e   :  { %v3979_v59 = vand.u32 4294901760, %v3978_v53  ;;  %v3936_v61 = vand.u32 4294901760, %v3853_v55  ;;  %v3928_v62 = vand.u32 4294901760, %v3927_v58 }
 0x570   :  { %v3937_v1 = vsub.f32 %v3853_v55, %v3936_v61 }
 0x574   :  { %v5494_v10 = vpop.eup %5493 }
 0x575   :  { %v3323_v12 = vsel %vm1202_vm2, %v5494_v10, 0.0  ;;  %v5496_v13 = vpop.eup %5495 }
 0x576   :  { %3324 = vadd.xlane.f32.xlu0 %v3323_v12  ;;  %v3326_v11 = vsel %vm1202_vm2, %v5496_v13, 0.0 }
 0x57a   :  { %3327 = vadd.xlane.f32.xlu0 %v3326_v11 }
 0x590   :  { %3847 = vrot.lane.b32.xlu0 %v5803_v44, %s5612_s17 }
 0x5ff   :  { %v3325_v0 = vpop.xlane.xlu0 %3324 }
 0x600   :  { %5497 = vrcp.f32 %v3325_v0 }
 0x603   :  { %v3328_v51 = vpop.xlane.xlu0 %3327 }
 0x604   :  { %5499 = vrcp.f32 %v3328_v51 }
 0x607   :  { %v3848_v18 = vpop.permute.xlu0 %3847 }
 0x608   :  { %v3855_v20 = vsel %vm691_vm1, %v3848_v18, 0 }
 0x609   :  { %v6156_v23 = vand.u32 4294901760, %v3855_v20 }
 0x60b   :  { %v6163_v32 = vsub.f32 %v3855_v20, %v6156_v23 }
 0x60d   :  { %v5498_v14 = vpop.eup %5497  ;;  %v6172_v49 = vand.u32 4294901760, %v6163_v32 }
 0x60e   :  { %v3330_v21 = vmul.f32 %v5498_v14, %v5494_v10 }
 0x60f   :  { %v3985_v57 = vsub.f32 %v6163_v32, %v6172_v49 }
 0x610   :  { %v3334_v22 = vsel %vm1202_vm2, %v3330_v21, 0 }
 0x611   :  { %v5500_v16 = vpop.eup %5499  ;;  %v3406_v44 = vand.u32 4294901760, %v3334_v22 }
 0x612   :  { %v3332_v28 = vmul.f32 %v5500_v16, %v5496_v13 }
 0x613   :  { %5344 = vmatprep.mubr.f32.mxu1 %v3406_v44  ;;  %v3407_v41 = vsub.f32 %v3334_v22, %v3406_v44 }
 0x614   :  { %v3337_v26 = vsel %vm1202_vm2, %v3332_v28, 0 }
 0x615   :  { %v3416_v35 = vand.u32 4294901760, %v3337_v26  ;;  %v3408_v36 = vand.u32 4294901760, %v3407_v41 }
 0x617   :  { %v3417_v43 = vsub.f32 %v3337_v26, %v3416_v35  ;;  %5345 = vmatmul.mubr.f32.vlgmr.msra.gmra.mxu1 %v3416_v35  ;;  %v3409_v45 = vsub.f32 %v3407_v41, %v3408_v36 }
 0x618   :  { %5355 = vmatpush3.msra.mxu1 %v6077_v24  ;;  %5358 = vmatprep.mubr.f32.mxu1 %v3408_v36 }
 0x619   :  { %5356 = vmatprep.subr.mxu1 %v6092_v30  ;;  %v3410_v46 = vand.u32 4294901760, %v3409_v45  ;;  %v3418_v48 = vand.u32 4294901760, %v3417_v43 }
 0x61a   :  { %5357 = vmatpush3.msra.mxu1 %v6092_v30 }
 0x61b   :  { %5368 = vmatprep.subr.mxu1 %v6077_v24  ;;  %5337 = vmatprep.mubr.f32.mxu0 %v3410_v46  ;;  %v3419_v54 = vsub.f32 %v3417_v43, %v3418_v48 }
 0x61c   :  { %5359 = vmatmul.mubr.f32.vlgmr.msra.gmra.mxu1 %v3418_v48 }
 0x61d   :  { %5369 = vmatpush3.msra.mxu1 %v6077_v24  ;;  %5372 = vmatprep.mubr.f32.mxu1 %v3406_v44  ;;  %v3420_v56 = vand.u32 4294901760, %v3419_v54  ;;  %v3986_v24 = vand.u32 4294901760, %v3985_v57 }
 0x61e   :  { %5370 = vmatprep.subr.mxu1 %v6092_v30 }
 0x61f   :  { %5371 = vmatpush3.msra.mxu1 %v6092_v30  ;;  %5338 = vmatmul.mubr.f32.vlgmr.msra.gmra.mxu0 %v3420_v56  ;;  %v3938_v30 = vand.u32 4294901760, %v3937_v1 }
 0x620   :  { %5382 = vmatprep.subr.mxu1 %v3979_v59  ;;  %5348 = vmatpush3.msra.mxu0 %v6087_v29  ;;  %v3929_v29 = vsub.f32 %v3927_v58, %v3928_v62 }
 0x621   :  { %5373 = vmatmul.mubr.f32.vlgmr.msra.gmra.mxu1 %v3416_v35  ;;  %5349 = vmatprep.subr.mxu0 %v6104_v34 }
 0x622   :  { %5383 = vmatpush3.xpose.msra.mxu1 %v3979_v59  ;;  %5351 = vmatprep.mubr.f32.mxu0 %v3407_v41  ;;  %v5510_v41 = vld [vmem:[#allocation7] sm:$0xff] }
 0x623   :  { %5384 = vmatprep.subr.mxu1 %v3986_v24  ;;  %5386 = vmatprep.mubr.f32.mxu1 %v6174_v50 }
 0x624   :  { %5350 = vmatpush3.msra.mxu0 %v6104_v34  ;;  %v3930_v34 = vand.u32 4294901760, %v3929_v29 }
 0x625   :  { %5361 = vmatprep.subr.mxu0 %v6100_v33  ;;  %5352 = vmatmul.mubr.f32.vlgmr.msra.gmra.mxu0 %v3417_v43 }
 0x626   :  { %5362 = vmatpush3.msra.mxu0 %v6100_v33  ;;  %5385 = vmatpush3.xpose.msra.mxu1 %v3986_v24  ;;  %v3939_v33 = vsub.f32 %v3937_v1, %v3938_v30 }
 0x627   :  { %5363 = vmatprep.subr.mxu0 %v6114_v37  ;;  %5365 = vmatprep.mubr.f32.mxu0 %v3406_v44 }
 0x628   :  { %5396 = vmatprep.subr.mxu1 %v6152_v19  ;;  %5364 = vmatpush3.msra.mxu0 %v6114_v37  ;;  %v3940_v37 = vand.u32 4294901760, %v3939_v33 }
 0x629   :  { %5375 = vmatprep.subr.mxu0 %v6152_v19  ;;  %5387 = vmatmul.mubr.f32.vlgmr.msra.gmra.mxu1 %v3936_v61 }
 0x62a   :  { %5366 = vmatmul.mubr.f32.vlgmr.msra.gmra.mxu0 %v3416_v35  ;;  %5397 = vmatpush3.xpose.msra.mxu1 %v6152_v19 }
 0x62b   :  { %5376 = vmatpush3.xpose.msra.mxu0 %v6152_v19  ;;  %5400 = vmatprep.mubr.f32.mxu1 %v3928_v62 }
 0x62c   :  { %5377 = vmatprep.subr.mxu0 %v6156_v23  ;;  %5379 = vmatprep.mubr.f32.mxu0 %v3930_v34 }
 0x62d   :  { %5398 = vmatprep.subr.mxu1 %v6156_v23 }
 0x62e   :  { %5399 = vmatpush3.xpose.msra.mxu1 %v6156_v23 }
 0x62f   :  { %5378 = vmatpush3.xpose.msra.mxu0 %v6156_v23  ;;  %5410 = vmatprep.subr.mxu1 %v6152_v19 }
 0x630   :  { %5389 = vmatprep.subr.mxu0 %v6159_v25 }
 0x631   :  { %5401 = vmatmul.mubr.f32.vlgmr.msra.gmra.mxu1 %v3938_v30 }
 0x632   :  { %5380 = vmatmul.mubr.f32.vlgmr.msra.gmra.mxu0 %v3940_v37  ;;  %5411 = vmatpush3.xpose.msra.mxu1 %v6152_v19 }
 0x633   :  { %5390 = vmatpush3.xpose.msra.mxu0 %v6159_v25  ;;  %5393 = vmatprep.mubr.f32.mxu0 %v3927_v58  ;;  %v5509_v25 = vld [vmem:[#allocation7 + $0x8] sm:$0xff] }
 0x634   :  { %5414 = vmatprep.mubr.f32.mxu1 %v6174_v50  ;;  %5391 = vmatprep.subr.mxu0 %v6163_v32 }
 0x635   :  { %5412 = vmatprep.subr.mxu1 %v6156_v23 }
 0x636   :  { %5413 = vmatpush3.xpose.msra.mxu1 %v6156_v23 }
 0x637   :  { %5392 = vmatpush3.xpose.msra.mxu0 %v6163_v32 }
 0x638   :  { %5403 = vmatprep.subr.mxu0 %v6166_v38 }
 0x639   :  { %5415 = vmatmul.mubr.f32.vlgmr.msra.gmra.mxu1 %v3936_v61 }
 0x63a   :  { %5394 = vmatmul.mubr.f32.vlgmr.msra.gmra.mxu0 %v3937_v1 }
 0x63b   :  { %5404 = vmatpush3.xpose.msra.mxu0 %v6166_v38  ;;  %5407 = vmatprep.mubr.f32.mxu0 %v6174_v50 }
 0x63c   :  { %5405 = vmatprep.subr.mxu0 %v6172_v49 }
 0x63f   :  { %5406 = vmatpush3.xpose.msra.mxu0 %v6172_v49 }
 0x642   :  { %5408 = vmatmul.mubr.f32.vlgmr.msra.gmra.mxu0 %v3936_v61 }
 0x6d7   :  { %v5346_v60 = vpop.f32.mrf.mxu1 }
 0x6d9   :  { %v3503_v63 = vpop.f32.mrf.mxu1 }
 0x6dc   :  { %v5360_v5 = vpop.f32.mrf.mxu1 }
 0x6de   :  { %v3667_v8 = vpop.f32.mrf.mxu1 }
 0x6df   :  { %v5339_v2 = vpop.f32.mrf.mxu0 }
 0x6e0   :  { %v3510_v3 = vadd.f32 %v5346_v60, %v5339_v2 }
 0x6e1   :  { %v3412_v4 = vpop.f32.mrf.mxu0  ;;  %v5374_v11 = vpop.f32.mrf.mxu1 }
 0x6e2   :  { %v3504_v6 = vadd.f32 %v3503_v63, %v3412_v4 }
 0x6e3   :  { %v3831_v19 = vpop.f32.mrf.mxu1 }
 0x6e5   :  { %v5353_v7 = vpop.f32.mrf.mxu0 }
 0x6e6   :  { %v3593_v9 = vadd.f32 %v5353_v7, %v3510_v3 }
 0x6e7   :  { %v3585_v10 = vpop.f32.mrf.mxu0 }
 0x6e8   :  { %v3586_v12 = vadd.f32 %v3585_v10, %v3504_v6  ;;  %v3676_v13 = vadd.f32 %v5360_v5, %v3593_v9 }
 0x6e9   :  { %v5388_v23 = vpop.f32.mrf.mxu1 }
 0x6ea   :  { %v5367_v0 = vpop.f32.mrf.mxu0  ;;  %v3668_v51 = vadd.f32 %v3667_v8, %v3586_v12 }
 0x6eb   :  { %v3759_v15 = vadd.f32 %v5367_v0, %v3676_v13  ;;  %v4023_v26 = vpop.f32.mrf.mxu1 }
 0x6ec   :  { %v3752_v17 = vpop.f32.mrf.mxu0 }
 0x6ed   :  { %v3838_v18 = vadd.f32 %v5374_v11, %v3759_v15  ;;  %v3753_v14 = vadd.f32 %v3752_v17, %v3668_v51 }
 0x6ef   :  { %v6218_v20 = vadd.f32 %v3838_v18, %v6137_v40  ;;  %v3832_v21 = vadd.f32 %v3831_v19, %v3753_v14 }
 0x6f1   :  { %v6221_v22 = vadd.f32 %v3832_v21, %v6139_v31  ;;  %v5402_v36 = vpop.f32.mrf.mxu1 }
 0x6f2   :  { %v5381_v16 = vpop.f32.mrf.mxu0 }
 0x6f3   :  { %v3943_v28 = vadd.f32 %v5509_v25, %v5381_v16  ;;  %v4187_v45 = vpop.f32.mrf.mxu1 }
 0x6f4   :  { %v3932_v44 = vpop.f32.mrf.mxu0 }
 0x6f5   :  { %v3933_v42 = vadd.f32 %v5510_v41, %v3932_v44  ;;  %v4030_v35 = vadd.f32 %v5388_v23, %v3943_v28 }
 0x6f7   :  { %v4024_v43 = vadd.f32 %v4023_v26, %v3933_v42 }
 0x6f9   :  { %v5416_v48 = vpop.f32.mrf.mxu1 }
 0x6fa   :  { %v5395_v32 = vpop.f32.mrf.mxu0 }
 0x6fb   :  { %v4113_v39 = vadd.f32 %v5395_v32, %v4030_v35  ;;  %v4351_v55 = vpop.f32.mrf.mxu1 }
 0x6fc   :  { %v4105_v38 = vpop.f32.mrf.mxu0 }
 0x6fd   :  { %v4106_v40 = vadd.f32 %v4105_v38, %v4024_v43  ;;  %v4196_v46 = vadd.f32 %v5402_v36, %v4113_v39 }
 0x6ff   :  { %v4188_v50 = vadd.f32 %v4187_v45, %v4106_v40 }
 0x702   :  { %v5409_v31 = vpop.f32.mrf.mxu0 }
 0x703   :  { %v4279_v49 = vadd.f32 %v5409_v31, %v4196_v46 }
 0x704   :  { %v4272_v52 = vpop.f32.mrf.mxu0 }
 0x705   :  { %v4273_v53 = vadd.f32 %v4272_v52, %v4188_v50  ;;  %v4358_v54 = vadd.f32 %v5416_v48, %v4279_v49 }
 0x707   :  { %v4364_v56 = vsel %vm1202_vm2, %v4358_v54, -inf  ;;  %v4352_v57 = vadd.f32 %v4351_v55, %v4273_v53 }
 0x708   :  { %4365 = vmax.xlane.f32.xlu1 %v4364_v56 }
 0x709   :  { %v4361_v58 = vsel %vm1202_vm2, %v4352_v57, -inf }
 0x70a   :  { %4362 = vmax.xlane.f32.xlu0 %v4361_v58  ;;  %v4930_v58 = vld [vmem:[%s6255_s4] ss:$0 sm:$0xff] }
 0x719   :  { %4387 = vrot.lane.b32.xlu1 %v6068_v27, %s5606_s11 }
 0x791   :  { %v4366_v59 = vpop.xlane.xlu1 %4365 }
 0x792   :  { %v4368_v61 = vsub.f32 %v4358_v54, %v4366_v59 }
 0x793   :  { %v4363_v24 = vpop.xlane.xlu0 %4362 }
 0x794   :  { %v4371_v62 = vmul.f32 1.442695, %v4368_v61  ;;  %v4367_v1 = vsub.f32 %v4352_v57, %v4363_v24 }
 0x795   :  { %v4388_v29 = vpop.permute.xlu1 %4387 }
 0x796   :  { %5501 = vpow2.f32 %v4371_v62  ;;  %v4369_v30 = vmul.f32 1.442695, %v4367_v1  ;;  %v4426_v34 = vand.u32 4294901760, %v4388_v29 }
 0x798   :  { %5503 = vpow2.f32 %v4369_v30  ;;  %v4514_v33 = vsub.f32 %v4388_v29, %v4426_v34  ;;  %5417 = vmatprep.subr.mxu0 %v4426_v34 }
 0x799   :  { %5418 = vmatpush3.msra.mxu0 %v4426_v34 }
 0x79a   :  { %v6227_v37 = vand.u32 4294901760, %v4514_v33 }
 0x79c   :  { %v4516_v60 = vsub.f32 %v4514_v33, %v6227_v37 }
 0x79e   :  { %v4517_v63 = vand.u32 4294901760, %v4516_v60 }
 0x7a0   :  { %5424 = vmatprep.subr.mxu1 %v4517_v63 }
 0x7a1   :  { %5425 = vmatpush3.msra.mxu1 %v4517_v63 }
 0x7a3   :  { %v5502_v27 = vpop.eup %5501 }
 0x7a4   :  { %v4376_v2 = vsel %vm1202_vm2, %v5502_v27, 0.0 }
 0x7a5   :  { %v5504_v3 = vpop.eup %5503  ;;  %4377 = vadd.xlane.f32.xlu0 %v4376_v2 }
 0x7a6   :  { %v4373_v4 = vsel %vm1202_vm2, %v5504_v3, 0.0 }
 0x7a9   :  { %4374 = vadd.xlane.f32.xlu0 %v4373_v4 }
 0x7bf   :  { %4385 = vrot.lane.b32.xlu0 %v5805_v47, %s5606_s11 }
 0x82e   :  { %v4378_v5 = vpop.xlane.xlu0 %4377 }
 0x82f   :  { %5505 = vrcp.f32 %v4378_v5 }
 0x832   :  { %v4375_v6 = vpop.xlane.xlu0 %4374 }
 0x833   :  { %5507 = vrcp.f32 %v4375_v6 }
 0x836   :  { %v4386_v7 = vpop.permute.xlu0 %4385 }
 0x837   :  { %v4429_v8 = vand.u32 4294901760, %v4386_v7 }
 0x839   :  { %v4521_v9 = vsub.f32 %v4386_v7, %v4429_v8  ;;  %5419 = vmatprep.subr.mxu0 %v4429_v8 }
 0x83a   :  { %5420 = vmatpush3.msra.mxu0 %v4429_v8 }
 0x83b   :  { %v4522_v10 = vand.u32 4294901760, %v4521_v9  ;;  %5431 = vmatprep.subr.mxu0 %v4514_v33 }
 0x83c   :  { %v5506_v12 = vpop.eup %5505 }
 0x83d   :  { %v4523_v13 = vsub.f32 %v4521_v9, %v4522_v10  ;;  %v4382_v11 = vmul.f32 %v5506_v12, %v5502_v27 }
 0x83f   :  { %v4524_v0 = vand.u32 4294901760, %v4523_v13  ;;  %v4395_v51 = vsel %vm1202_vm2, %v4382_v11, 0 }
 0x840   :  { %v5508_v15 = vpop.eup %5507  ;;  %v4474_v17 = vand.u32 4294901760, %v4395_v51 }
 0x841   :  { %5426 = vmatprep.subr.mxu1 %v4524_v0  ;;  %v4380_v47 = vmul.f32 %v5508_v15, %v5504_v3 }
 0x842   :  { %5427 = vmatpush3.msra.mxu1 %v4524_v0  ;;  %v4475_v18 = vsub.f32 %v4395_v51, %v4474_v17 }
 0x843   :  { %5438 = vmatprep.subr.mxu1 %v4426_v34  ;;  %v4392_v14 = vsel %vm1202_vm2, %v4380_v47, 0 }
 0x844   :  { %v4464_v19 = vand.u32 4294901760, %v4392_v14  ;;  %v4476_v21 = vand.u32 4294901760, %v4475_v18 }
 0x846   :  { %5428 = vmatprep.mubr.f32.mxu1 %v4464_v19  ;;  %v4465_v16 = vsub.f32 %v4392_v14, %v4464_v19  ;;  %v4477_v44 = vsub.f32 %v4475_v18, %v4476_v21 }
 0x847   :  { %5429 = vmatmul.mubr.f32.vlgmr.msra.gmra.mxu1 %v4474_v17 }
 0x848   :  { %5439 = vmatpush3.msra.mxu1 %v4426_v34  ;;  %v4466_v23 = vand.u32 4294901760, %v4465_v16  ;;  %v4478_v41 = vand.u32 4294901760, %v4477_v44 }
 0x849   :  { %5440 = vmatprep.subr.mxu1 %v4429_v8 }
 0x84a   :  { %5441 = vmatpush3.msra.mxu1 %v4429_v8  ;;  %5442 = vmatprep.mubr.f32.mxu1 %v4466_v23  ;;  %v4467_v25 = vsub.f32 %v4465_v16, %v4466_v23 }
 0x84b   :  { %5452 = vmatprep.subr.mxu1 %v4426_v34  ;;  %5443 = vmatmul.mubr.f32.vlgmr.msra.gmra.mxu1 %v4476_v21 }
 0x84c   :  { %5453 = vmatpush3.msra.mxu1 %v4426_v34  ;;  %5456 = vmatprep.mubr.f32.mxu1 %v4464_v19  ;;  %v4468_v28 = vand.u32 4294901760, %v4467_v25 }
 0x84d   :  { %5454 = vmatprep.subr.mxu1 %v4429_v8 }
 0x84e   :  { %5455 = vmatpush3.msra.mxu1 %v4429_v8  ;;  %5421 = vmatprep.mubr.f32.mxu0 %v4468_v28 }
 0x84f   :  { %5422 = vmatmul.mubr.f32.vlgmr.msra.gmra.mxu0 %v4478_v41  ;;  %5457 = vmatmul.mubr.f32.vlgmr.msra.gmra.mxu1 %v4474_v17 }
 0x850   :  { %5432 = vmatpush3.msra.mxu0 %v4514_v33  ;;  %5435 = vmatprep.mubr.f32.mxu0 %v4465_v16 }
 0x851   :  { %5433 = vmatprep.subr.mxu0 %v4521_v9 }
 0x852   :  { %5434 = vmatpush3.msra.mxu0 %v4521_v9 }
 0x853   :  { %5445 = vmatprep.subr.mxu0 %v6227_v37  ;;  %5436 = vmatmul.mubr.f32.vlgmr.msra.gmra.mxu0 %v4475_v18 }
 0x854   :  { %5446 = vmatpush3.msra.mxu0 %v6227_v37  ;;  %5449 = vmatprep.mubr.f32.mxu0 %v4464_v19 }
 0x855   :  { %5447 = vmatprep.subr.mxu0 %v4522_v10 }
 0x856   :  { %5448 = vmatpush3.msra.mxu0 %v4522_v10 }
 0x857   :  { %5450 = vmatmul.mubr.f32.vlgmr.msra.gmra.mxu0 %v4474_v17 }
 0x907   :  { %v5430_v42 = vpop.f32.mrf.mxu1 }
 0x909   :  { %v4561_v26 = vpop.f32.mrf.mxu1 }
 0x90b   :  { %v5444_v32 = vpop.f32.mrf.mxu1 }
 0x90d   :  { %v4725_v39 = vpop.f32.mrf.mxu1 }
 0x90f   :  { %v5423_v35 = vpop.f32.mrf.mxu0  ;;  %v5458_v49 = vpop.f32.mrf.mxu1 }
 0x910   :  { %v4568_v38 = vadd.f32 %v5430_v42, %v5423_v35 }
 0x911   :  { %v4470_v36 = vpop.f32.mrf.mxu0  ;;  %v4889_v57 = vpop.f32.mrf.mxu1 }
 0x912   :  { %v4562_v40 = vadd.f32 %v4561_v26, %v4470_v36 }
 0x913   :  { %v5437_v43 = vpop.f32.mrf.mxu0 }
 0x914   :  { %v4651_v45 = vadd.f32 %v5437_v43, %v4568_v38 }
 0x915   :  { %v4643_v46 = vpop.f32.mrf.mxu0 }
 0x916   :  { %v4644_v48 = vadd.f32 %v4643_v46, %v4562_v40  ;;  %v4734_v31 = vadd.f32 %v5444_v32, %v4651_v45 }
 0x917   :  { %v5451_v50 = vpop.f32.mrf.mxu0 }
 0x918   :  { %v4817_v52 = vadd.f32 %v5451_v50, %v4734_v31  ;;  %v4726_v53 = vadd.f32 %v4725_v39, %v4644_v48 }
 0x919   :  { %v4810_v54 = vpop.f32.mrf.mxu0 }
 0x91a   :  { %v4896_v55 = vadd.f32 %v5458_v49, %v4817_v52  ;;  %v4811_v56 = vadd.f32 %v4810_v54, %v4726_v53 }
 0x91c   :  { %v4900_v59 = vadd.f32 %v4896_v55, %v6218_v20  ;;  %v4890_v61 = vadd.f32 %v4889_v57, %v4811_v56 }
 0x91e   :  { %v4909_v24 = vadd.f32 %v4930_v58, %v4900_v59  ;;  %v4899_v62 = vadd.f32 %v4890_v61, %v6221_v22 }
 0x920   :  { %4911 = vst.msk [vmem:[#allocation8 + $0x8] sm:$0xff] %vm84_vm0, %v4909_v24  ;;  %v4908_v1 = vadd.f32 %v4930_v58, %v4899_v62 }
 0x922   :  { %4910 = vst.msk [vmem:[#allocation8] sm:$0xff] %vm84_vm0, %v4908_v1 }
 0x923   :  { %5582 = shalt.err (!%p5579_p5)
}
 0x924   :  { %4923 = dma.vmem_to_hbm [thread:$0]  %s4918_s22, 256, %s6256_s5, [#allocation4], %s5601_s28, %s5601_s28, %s5602_s29  }
 0x925   :  { %5595 = dma.done.wait [#allocation4], 256  }
 0x926   :  { %5596 = vsyncadd [#allocation4], 4294967040 }
 0x927   :  { %4927 = vsyncpa [#allocation3], 1 }
 0x928   :  { %4928 = vsyncpa [#allocation6], 1 }
 0x929   :  { %4929 = vsyncpa [#allocation4], 1 }

</bundles_post_ra>
